<compile_context>
chip_gen: v6e
topology: v6e:2x2x1
jax: 0.10.0
libtpu: 0.0.40
codegen_flags: <defaults>
</compile_context>

<pallas_src>
import math

import jax
import jax.numpy as jnp
from jax import lax
from jax.experimental import pallas as pl
from jax.experimental.pallas import tpu as pltpu

KMAX = 15                   # widest branch kernel
PAD = (KMAX - 1) // 2       # 7
KSIZES = (3, 7, 11, 15)     # spectral1..spectral4 kernel widths


def _pick_tile(length, seg, target, lane_multiple):
    """Largest divisor of `length` that is a multiple of lcm(seg, lane_multiple)
    and <= target (else the smallest such divisor, else `length` itself)."""
    unit = seg * lane_multiple // math.gcd(seg, lane_multiple)
    cands = [m for m in range(unit, length + 1, unit) if length % m == 0]
    if not cands:
        return length
    under = [m for m in cands if m <= target]
    return max(under) if under else min(cands)


def _band_plan(C, c, sub):
    """Static per-band (row_start, row_count, tap_half_width) plan.

    Channel groups [g*c,(g+1)*c) have ascending kernel sizes KSIZES, so a
    sublane-aligned band of rows only needs the taps of its widest member
    group -> the structurally-zero taps of the fused 15-tap weight are
    skipped (saving quantized to the sublane pack size `sub`).
    """
    bands = []
    r0 = 0
    while r0 < C:
        rs = min(sub, C - r0)
        hw = 0
        for g, K in enumerate(KSIZES):
            g0, g1 = g * c, (g + 1) * c
            if g0 < r0 + rs and g1 > r0:
                hw = max(hw, (K - 1) // 2)
        bands.append((r0, rs, hw))
        r0 += rs
    return bands


def _make_kernel(bands, l_tile, chunk, compute_dtype):
    """x_ref: (1,C,l_tile)  w_ref: (C,KMAX)  m_ref: (KMAX,l_tile)  b_ref: (C,1)."""

    def kernel(x_ref, w_ref, m_ref, b_ref, o_ref):
        for (r0, rs, hw) in bands:                      # sublane-aligned bands
            for q0 in range(0, l_tile, chunk):          # register-resident lane chunks
                xb = x_ref[0, r0:r0 + rs, q0:q0 + chunk].astype(compute_dtype)
                # Accumulator initialized with the folded bias/BN shift (f32).
                acc = jnp.broadcast_to(b_ref[r0:r0 + rs, :],
                                       (rs, chunk)).astype(jnp.float32)
                for k in range(PAD - hw, PAD + hw + 1):  # only non-zero taps
                    s = k - PAD
                    # Circular lane rotation on the XLU; wrap positions are
                    # always killed by the 'same'-padding validity row below
                    # (chunk is a multiple of Wb).
                    xk = xb if s == 0 else pltpu.roll(xb, shift=(-s) % chunk, axis=1)
                    valid = m_ref[k:k + 1, q0:q0 + chunk] != 0.0     # (1, chunk)
                    xk = jnp.where(valid, xk, 0.0)       # true zero padding (NaN-safe)
                    acc = acc + xk * w_ref[r0:r0 + rs, k:k + 1]
                o_ref[0, r0:r0 + rs, q0:q0 + chunk] = (
                    jnp.clip(acc, 0.0, 6.0).astype(o_ref.dtype))     # ReLU6

    return kernel


def mspefe_forward(x, conv_ws, conv_bs, gamma, beta, run_mean, run_var,
                   eps=1e-5, compute_dtype=jnp.float32,
                   l_tile_target=4096, chunk_target=512):
    """x: (N, C, D, H, Wb) NCDHW, C = 4*c.

    conv_ws: list of 4 arrays, group g has shape (c, K_g) depthwise taps.
    conv_bs / gamma / beta / run_mean / run_var: (C,) params / running stats.
    compute_dtype: jnp.float32 (default; v5e) or jnp.bfloat16 (v6e/v7x).
    """
    N, C, D, H, Wb = x.shape
    c = C // 4
    assert C == 4 * c and c >= 1
    L = D * H * Wb
    compute_dtype = jnp.dtype(compute_dtype)

    # Fuse the 4 branch kernels into centered 15-tap depthwise weights.
    w_full = jnp.zeros((C, KMAX), jnp.float32)
    for g, K in enumerate(KSIZES):
        off = (KMAX - K) // 2
        w_full = w_full.at[g * c:(g + 1) * c, off:off + K].set(conv_ws[g])

    # Fold BatchNorm (eval mode) into per-channel scale/shift.
    scale = gamma / jnp.sqrt(run_var + eps)
    shift = ((conv_bs - run_mean) * scale + beta).astype(jnp.float32)[:, None]
    w_eff = (w_full * scale[:, None]).astype(compute_dtype)

    # L-axis grid tile (multiple of Wb and 128, or full L) + in-kernel chunk.
    l_tile = _pick_tile(L, Wb, l_tile_target, 128)
    chunk = _pick_tile(l_tile, Wb, chunk_target, 128)

    # Per-tap 'same'-padding validity rows; pattern is periodic with period Wb
    # and reused for every L tile.
    wpos = jnp.arange(Wb)[None, :]
    offs = (jnp.arange(KMAX) - PAD)[:, None]
    valid = ((wpos + offs) >= 0) & ((wpos + offs) < Wb)          # (KMAX, Wb)
    mask = jnp.tile(valid.astype(jnp.float32), (1, l_tile // Wb))  # (KMAX, l_tile)

    sub = 8 * (4 // compute_dtype.itemsize)      # sublanes per vreg pack (8 f32 / 16 bf16)
    bands = _band_plan(C, c, sub)
    kernel = _make_kernel(bands, l_tile, chunk, compute_dtype)

    x_flat = x.reshape(N, C, L)                  # free reshape, lane-dense layout

    # Explicit VMEM budget: double-buffered in/out blocks + small residents,
    # generous headroom, capped for v7x (64 MiB physical).
    itemsize = x.dtype.itemsize
    est = (2 * 2 * C * l_tile * itemsize
           + 2 * (C * KMAX * compute_dtype.itemsize + KMAX * l_tile * 4 + C * 4))
    vmem_limit = int(min(48 << 20, max(32 << 20, 2 * est)))

    out = pl.pallas_call(
        kernel,
        out_shape=jax.ShapeDtypeStruct((N, C, L), x.dtype),
        grid=(N, L // l_tile),
        in_specs=[
            pl.BlockSpec((1, C, l_tile), lambda n, l: (n, 0, l)),   # per-batch/L-tile data
            pl.BlockSpec((C, KMAX), lambda n, l: (0, 0)),           # fused taps, resident
            pl.BlockSpec((KMAX, l_tile), lambda n, l: (0, 0)),      # padding masks, resident
            pl.BlockSpec((C, 1), lambda n, l: (0, 0)),              # folded shift, resident
        ],
        out_specs=pl.BlockSpec((1, C, l_tile), lambda n, l: (n, 0, l)),
        compiler_params=pltpu.CompilerParams(
            dimension_semantics=("parallel", "parallel"),
            vmem_limit_bytes=vmem_limit),
    )(x_flat, w_eff, mask, shift)

    return out.reshape(N, C, D, H, Wb)           # free reshape back to NCDHW


def mspefe_reference(x, conv_ws, conv_bs, gamma, beta, run_mean, run_var,
                     eps=1e-5):
    """Pure-JAX reference using lax.conv_general_dilated (per branch)."""
    N, C, D, H, Wb = x.shape
    c = C // 4
    outs = []
    for g, K in enumerate(KSIZES):
        xg = x[:, g * c:(g + 1) * c]                              # (N,c,D,H,Wb)
        xg2 = jnp.transpose(xg, (0, 2, 3, 1, 4)).reshape(N * D * H, c, Wb)
        rhs = conv_ws[g][:, None, :]                              # (c,1,K) OIW
        y = lax.conv_general_dilated(
            xg2, rhs, window_strides=(1,), padding=[((K - 1) // 2,) * 2],
            dimension_numbers=("NCH", "OIH", "NCH"), feature_group_count=c)
        sl = slice(g * c, (g + 1) * c)
        y = y + conv_bs[sl][None, :, None]
        sc = gamma[sl] / jnp.sqrt(run_var[sl] + eps)
        y = (y - run_mean[sl][None, :, None]) * sc[None, :, None] \
            + beta[sl][None, :, None]
        y = jnp.clip(y, 0.0, 6.0)
        y = jnp.transpose(y.reshape(N, D, H, c, Wb), (0, 3, 1, 2, 4))
        outs.append(y)
    return jnp.concatenate(outs, axis=1)


def _run_case(key, channels, N, D, H, Wb, compute_dtype=jnp.float32,
              l_tile_target=4096, chunk_target=512, atol=1e-5, rtol=1e-5):
    c = channels // 4
    C = 4 * c
    keys = jax.random.split(key, 8)
    x = jax.random.normal(keys[0], (N, C, D, H, Wb), dtype=jnp.float32)
    conv_ws = [jax.random.normal(jax.random.fold_in(keys[1], g),
                                 (c, K), dtype=jnp.float32) * 0.2
               for g, K in enumerate(KSIZES)]
    conv_bs = jax.random.normal(keys[2], (C,), dtype=jnp.float32) * 0.1
    gamma = 1.0 + 0.1 * jax.random.normal(keys[3], (C,), dtype=jnp.float32)
    beta = 0.1 * jax.random.normal(keys[4], (C,), dtype=jnp.float32)
    run_mean = 0.05 * jax.random.normal(keys[5], (C,), dtype=jnp.float32)
    run_var = 1.0 + 0.1 * jax.random.uniform(keys[6], (C,), dtype=jnp.float32)

    out = jax.block_until_ready(
        mspefe_forward(x, conv_ws, conv_bs, gamma, beta, run_mean, run_var,
                       compute_dtype=compute_dtype,
                       l_tile_target=l_tile_target, chunk_target=chunk_target))
    ref = mspefe_reference(x, conv_ws, conv_bs, gamma, beta, run_mean, run_var)
    assert out.shape == (N, C, D, H, Wb), out.shape
    err = float(jnp.max(jnp.abs(out - ref)))
    assert jnp.allclose(out, ref, atol=atol, rtol=rtol), err


if __name__ == "__main__":
    key = jax.random.PRNGKey(0)
    k1, k2, k3, k4 = jax.random.split(key, 4)
    # Main case: MSpeFE(16) -> c=4, C=16; L = 4*4*16 = 256 lanes (single tile).
    _run_case(k1, channels=16, N=2, D=4, H=4, Wb=16)
    # Boundary case: spectral axis (Wb=8) shorter than the widest 15-tap
    # kernel -> exercises the in-kernel zero-'same'-padding at both edges.
    _run_case(k2, channels=8, N=1, D=4, H=4, Wb=8)
    # Tiling case: L = 512 split into two 256-lane grid tiles, each processed
    # in two 128-lane register-resident chunks (exercises both loops).
    _run_case(k3, channels=16, N=1, D=4, H=8, Wb=16,
              l_tile_target=256, chunk_target=128)
    # bf16-compute path (v6e/v7x VALU throughput); accumulator stays f32,
    # tolerance relaxed vs the f32 reference.
    _run_case(k4, channels=16, N=2, D=4, H=4, Wb=16,
              compute_dtype=jnp.bfloat16, atol=0.25, rtol=0.05)
    print("KERNEL_OK")
</pallas_src>

<mosaic_0001>
module attributes {stable_mosaic.version = 11 : i64} {
  func.func @kernel(%arg0: i32, %arg1: i32, %arg2: memref<1x16x256xf32, #tpu.memory_space<vmem>>, %arg3: memref<16x15xf32, #tpu.memory_space<vmem>>, %arg4: memref<15x256xf32, #tpu.memory_space<vmem>>, %arg5: memref<16x1xf32, #tpu.memory_space<vmem>>, %arg6: memref<1x16x256xf32, #tpu.memory_space<vmem>>) attributes {dimension_semantics = [#tpu.dimension_semantics<parallel>, #tpu.dimension_semantics<parallel>], iteration_bounds = array<i64: 2, 1>, scalar_prefetch = 0 : i64, scratch_operands = 0 : i64, tpu.core_type = #tpu.core_type<tc>, window_params = [{transform_indices = @transform_0, window_bounds = array<i64: 1, 16, 256>}, {pipeline_mode = #tpu.pipeline_mode<synchronous>, transform_indices = @transform_1, window_bounds = array<i64: 16, 15>}, {pipeline_mode = #tpu.pipeline_mode<synchronous>, transform_indices = @transform_2, window_bounds = array<i64: 15, 256>}, {pipeline_mode = #tpu.pipeline_mode<synchronous>, transform_indices = @transform_3, window_bounds = array<i64: 16, 1>}, {transform_indices = @transform_4, window_bounds = array<i64: 1, 16, 256>}]} {
    %c0 = arith.constant 0 : index
    %c0_0 = arith.constant 0 : index
    %c0_1 = arith.constant 0 : index
    %0 = vector.load %arg2[%c0, %c0_0, %c0_1] : memref<1x16x256xf32, #tpu.memory_space<vmem>>, vector<1x8x256xf32>
    %1 = vector.shape_cast %0 : vector<1x8x256xf32> to vector<8x256xf32>
    %c0_2 = arith.constant 0 : index
    %c0_3 = arith.constant 0 : index
    %2 = vector.load %arg5[%c0_2, %c0_3] : memref<16x1xf32, #tpu.memory_space<vmem>>, vector<8x1xf32>
    %3 = vector.shape_cast %2 : vector<8x1xf32> to vector<8x1xf32>
    %4 = vector.broadcast %3 : vector<8x1xf32> to vector<8x256xf32>
    %c3_i32 = arith.constant 3 : i32
    %5 = tpu.dynamic_rotate %1 by %c3_i32 dim 1 : vector<8x256xf32>, i32 -> vector<8x256xf32>
    %c4 = arith.constant 4 : index
    %c0_4 = arith.constant 0 : index
    %6 = vector.load %arg4[%c4, %c0_4] : memref<15x256xf32, #tpu.memory_space<vmem>>, vector<1x256xf32>
    %cst = arith.constant 0.000000e+00 : f32
    %7 = vector.broadcast %cst : f32 to vector<1x256xf32>
    %8 = arith.cmpf one, %6, %7 : vector<1x256xf32>
    %cst_5 = arith.constant 0.000000e+00 : f32
    %9 = vector.shape_cast %8 : vector<1x256xi1> to vector<1x256xi1>
    %10 = vector.broadcast %9 : vector<1x256xi1> to vector<8x256xi1>
    %11 = vector.broadcast %cst_5 : f32 to vector<8x256xf32>
    %12 = arith.select %10, %5, %11 : vector<8x256xi1>, vector<8x256xf32>
    %c0_6 = arith.constant 0 : index
    %c4_7 = arith.constant 4 : index
    %13 = vector.load %arg3[%c0_6, %c4_7] : memref<16x15xf32, #tpu.memory_space<vmem>>, vector<8x1xf32>
    %14 = vector.broadcast %13 : vector<8x1xf32> to vector<8x256xf32>
    %15 = arith.mulf %12, %14 : vector<8x256xf32>
    %16 = arith.addf %4, %15 : vector<8x256xf32>
    %c2_i32 = arith.constant 2 : i32
    %17 = tpu.dynamic_rotate %1 by %c2_i32 dim 1 : vector<8x256xf32>, i32 -> vector<8x256xf32>
    %c5 = arith.constant 5 : index
    %c0_8 = arith.constant 0 : index
    %18 = vector.load %arg4[%c5, %c0_8] : memref<15x256xf32, #tpu.memory_space<vmem>>, vector<1x256xf32>
    %cst_9 = arith.constant 0.000000e+00 : f32
    %19 = vector.broadcast %cst_9 : f32 to vector<1x256xf32>
    %20 = arith.cmpf one, %18, %19 : vector<1x256xf32>
    %cst_10 = arith.constant 0.000000e+00 : f32
    %21 = vector.shape_cast %20 : vector<1x256xi1> to vector<1x256xi1>
    %22 = vector.broadcast %21 : vector<1x256xi1> to vector<8x256xi1>
    %23 = vector.broadcast %cst_10 : f32 to vector<8x256xf32>
    %24 = arith.select %22, %17, %23 : vector<8x256xi1>, vector<8x256xf32>
    %c0_11 = arith.constant 0 : index
    %c5_12 = arith.constant 5 : index
    %25 = vector.load %arg3[%c0_11, %c5_12] : memref<16x15xf32, #tpu.memory_space<vmem>>, vector<8x1xf32>
    %26 = vector.broadcast %25 : vector<8x1xf32> to vector<8x256xf32>
    %27 = arith.mulf %24, %26 : vector<8x256xf32>
    %28 = arith.addf %16, %27 : vector<8x256xf32>
    %c1_i32 = arith.constant 1 : i32
    %29 = tpu.dynamic_rotate %1 by %c1_i32 dim 1 : vector<8x256xf32>, i32 -> vector<8x256xf32>
    %c6 = arith.constant 6 : index
    %c0_13 = arith.constant 0 : index
    %30 = vector.load %arg4[%c6, %c0_13] : memref<15x256xf32, #tpu.memory_space<vmem>>, vector<1x256xf32>
    %cst_14 = arith.constant 0.000000e+00 : f32
    %31 = vector.broadcast %cst_14 : f32 to vector<1x256xf32>
    %32 = arith.cmpf one, %30, %31 : vector<1x256xf32>
    %cst_15 = arith.constant 0.000000e+00 : f32
    %33 = vector.shape_cast %32 : vector<1x256xi1> to vector<1x256xi1>
    %34 = vector.broadcast %33 : vector<1x256xi1> to vector<8x256xi1>
    %35 = vector.broadcast %cst_15 : f32 to vector<8x256xf32>
    %36 = arith.select %34, %29, %35 : vector<8x256xi1>, vector<8x256xf32>
    %c0_16 = arith.constant 0 : index
    %c6_17 = arith.constant 6 : index
    %37 = vector.load %arg3[%c0_16, %c6_17] : memref<16x15xf32, #tpu.memory_space<vmem>>, vector<8x1xf32>
    %38 = vector.broadcast %37 : vector<8x1xf32> to vector<8x256xf32>
    %39 = arith.mulf %36, %38 : vector<8x256xf32>
    %40 = arith.addf %28, %39 : vector<8x256xf32>
    %c7 = arith.constant 7 : index
    %c0_18 = arith.constant 0 : index
    %41 = vector.load %arg4[%c7, %c0_18] : memref<15x256xf32, #tpu.memory_space<vmem>>, vector<1x256xf32>
    %cst_19 = arith.constant 0.000000e+00 : f32
    %42 = vector.broadcast %cst_19 : f32 to vector<1x256xf32>
    %43 = arith.cmpf one, %41, %42 : vector<1x256xf32>
    %cst_20 = arith.constant 0.000000e+00 : f32
    %44 = vector.shape_cast %43 : vector<1x256xi1> to vector<1x256xi1>
    %45 = vector.broadcast %44 : vector<1x256xi1> to vector<8x256xi1>
    %46 = vector.broadcast %cst_20 : f32 to vector<8x256xf32>
    %47 = arith.select %45, %1, %46 : vector<8x256xi1>, vector<8x256xf32>
    %c0_21 = arith.constant 0 : index
    %c7_22 = arith.constant 7 : index
    %48 = vector.load %arg3[%c0_21, %c7_22] : memref<16x15xf32, #tpu.memory_space<vmem>>, vector<8x1xf32>
    %49 = vector.broadcast %48 : vector<8x1xf32> to vector<8x256xf32>
    %50 = arith.mulf %47, %49 : vector<8x256xf32>
    %51 = arith.addf %40, %50 : vector<8x256xf32>
    %c255_i32 = arith.constant 255 : i32
    %52 = tpu.dynamic_rotate %1 by %c255_i32 dim 1 : vector<8x256xf32>, i32 -> vector<8x256xf32>
    %c8 = arith.constant 8 : index
    %c0_23 = arith.constant 0 : index
    %53 = vector.load %arg4[%c8, %c0_23] : memref<15x256xf32, #tpu.memory_space<vmem>>, vector<1x256xf32>
    %cst_24 = arith.constant 0.000000e+00 : f32
    %54 = vector.broadcast %cst_24 : f32 to vector<1x256xf32>
    %55 = arith.cmpf one, %53, %54 : vector<1x256xf32>
    %cst_25 = arith.constant 0.000000e+00 : f32
    %56 = vector.shape_cast %55 : vector<1x256xi1> to vector<1x256xi1>
    %57 = vector.broadcast %56 : vector<1x256xi1> to vector<8x256xi1>
    %58 = vector.broadcast %cst_25 : f32 to vector<8x256xf32>
    %59 = arith.select %57, %52, %58 : vector<8x256xi1>, vector<8x256xf32>
    %c0_26 = arith.constant 0 : index
    %c8_27 = arith.constant 8 : index
    %60 = vector.load %arg3[%c0_26, %c8_27] : memref<16x15xf32, #tpu.memory_space<vmem>>, vector<8x1xf32>
    %61 = vector.broadcast %60 : vector<8x1xf32> to vector<8x256xf32>
    %62 = arith.mulf %59, %61 : vector<8x256xf32>
    %63 = arith.addf %51, %62 : vector<8x256xf32>
    %c254_i32 = arith.constant 254 : i32
    %64 = tpu.dynamic_rotate %1 by %c254_i32 dim 1 : vector<8x256xf32>, i32 -> vector<8x256xf32>
    %c9 = arith.constant 9 : index
    %c0_28 = arith.constant 0 : index
    %65 = vector.load %arg4[%c9, %c0_28] : memref<15x256xf32, #tpu.memory_space<vmem>>, vector<1x256xf32>
    %cst_29 = arith.constant 0.000000e+00 : f32
    %66 = vector.broadcast %cst_29 : f32 to vector<1x256xf32>
    %67 = arith.cmpf one, %65, %66 : vector<1x256xf32>
    %cst_30 = arith.constant 0.000000e+00 : f32
    %68 = vector.shape_cast %67 : vector<1x256xi1> to vector<1x256xi1>
    %69 = vector.broadcast %68 : vector<1x256xi1> to vector<8x256xi1>
    %70 = vector.broadcast %cst_30 : f32 to vector<8x256xf32>
    %71 = arith.select %69, %64, %70 : vector<8x256xi1>, vector<8x256xf32>
    %c0_31 = arith.constant 0 : index
    %c9_32 = arith.constant 9 : index
    %72 = vector.load %arg3[%c0_31, %c9_32] : memref<16x15xf32, #tpu.memory_space<vmem>>, vector<8x1xf32>
    %73 = vector.broadcast %72 : vector<8x1xf32> to vector<8x256xf32>
    %74 = arith.mulf %71, %73 : vector<8x256xf32>
    %75 = arith.addf %63, %74 : vector<8x256xf32>
    %c253_i32 = arith.constant 253 : i32
    %76 = tpu.dynamic_rotate %1 by %c253_i32 dim 1 : vector<8x256xf32>, i32 -> vector<8x256xf32>
    %c10 = arith.constant 10 : index
    %c0_33 = arith.constant 0 : index
    %77 = vector.load %arg4[%c10, %c0_33] : memref<15x256xf32, #tpu.memory_space<vmem>>, vector<1x256xf32>
    %cst_34 = arith.constant 0.000000e+00 : f32
    %78 = vector.broadcast %cst_34 : f32 to vector<1x256xf32>
    %79 = arith.cmpf one, %77, %78 : vector<1x256xf32>
    %cst_35 = arith.constant 0.000000e+00 : f32
    %80 = vector.shape_cast %79 : vector<1x256xi1> to vector<1x256xi1>
    %81 = vector.broadcast %80 : vector<1x256xi1> to vector<8x256xi1>
    %82 = vector.broadcast %cst_35 : f32 to vector<8x256xf32>
    %83 = arith.select %81, %76, %82 : vector<8x256xi1>, vector<8x256xf32>
    %c0_36 = arith.constant 0 : index
    %c10_37 = arith.constant 10 : index
    %84 = vector.load %arg3[%c0_36, %c10_37] : memref<16x15xf32, #tpu.memory_space<vmem>>, vector<8x1xf32>
    %85 = vector.broadcast %84 : vector<8x1xf32> to vector<8x256xf32>
    %86 = arith.mulf %83, %85 : vector<8x256xf32>
    %87 = arith.addf %75, %86 : vector<8x256xf32>
    %cst_38 = arith.constant 0.000000e+00 : f32
    %cst_39 = arith.constant 6.000000e+00 : f32
    %88 = vector.broadcast %cst_38 : f32 to vector<8x256xf32>
    %89 = arith.maximumf %88, %87 : vector<8x256xf32>
    %90 = vector.broadcast %cst_39 : f32 to vector<8x256xf32>
    %91 = arith.minimumf %90, %89 : vector<8x256xf32>
    %c0_40 = arith.constant 0 : index
    %c0_41 = arith.constant 0 : index
    %c0_42 = arith.constant 0 : index
    %92 = vector.load %arg6[%c0_40, %c0_41, %c0_42] : memref<1x16x256xf32, #tpu.memory_space<vmem>>, vector<1x8x256xf32>
    %93 = vector.shape_cast %92 : vector<1x8x256xf32> to vector<8x256xf32>
    %94 = vector.shape_cast %91 : vector<8x256xf32> to vector<1x8x256xf32>
    tpu.vector_store %arg6[%c0_40, %c0_41, %c0_42], %94 {strides = array<i32>} : memref<1x16x256xf32, #tpu.memory_space<vmem>>, vector<1x8x256xf32>,
    %c0_43 = arith.constant 0 : index
    %c8_44 = arith.constant 8 : index
    %c0_45 = arith.constant 0 : index
    %95 = vector.load %arg2[%c0_43, %c8_44, %c0_45] : memref<1x16x256xf32, #tpu.memory_space<vmem>>, vector<1x8x256xf32>
    %96 = vector.shape_cast %95 : vector<1x8x256xf32> to vector<8x256xf32>
    %c8_46 = arith.constant 8 : index
    %c0_47 = arith.constant 0 : index
    %97 = vector.load %arg5[%c8_46, %c0_47] : memref<16x1xf32, #tpu.memory_space<vmem>>, vector<8x1xf32>
    %98 = vector.shape_cast %97 : vector<8x1xf32> to vector<8x1xf32>
    %99 = vector.broadcast %98 : vector<8x1xf32> to vector<8x256xf32>
    %c7_i32 = arith.constant 7 : i32
    %100 = tpu.dynamic_rotate %96 by %c7_i32 dim 1 : vector<8x256xf32>, i32 -> vector<8x256xf32>
    %c0_48 = arith.constant 0 : index
    %c0_49 = arith.constant 0 : index
    %101 = vector.load %arg4[%c0_48, %c0_49] : memref<15x256xf32, #tpu.memory_space<vmem>>, vector<1x256xf32>
    %cst_50 = arith.constant 0.000000e+00 : f32
    %102 = vector.broadcast %cst_50 : f32 to vector<1x256xf32>
    %103 = arith.cmpf one, %101, %102 : vector<1x256xf32>
    %cst_51 = arith.constant 0.000000e+00 : f32
    %104 = vector.shape_cast %103 : vector<1x256xi1> to vector<1x256xi1>
    %105 = vector.broadcast %104 : vector<1x256xi1> to vector<8x256xi1>
    %106 = vector.broadcast %cst_51 : f32 to vector<8x256xf32>
    %107 = arith.select %105, %100, %106 : vector<8x256xi1>, vector<8x256xf32>
    %c8_52 = arith.constant 8 : index
    %c0_53 = arith.constant 0 : index
    %108 = vector.load %arg3[%c8_52, %c0_53] : memref<16x15xf32, #tpu.memory_space<vmem>>, vector<8x1xf32>
    %109 = vector.broadcast %108 : vector<8x1xf32> to vector<8x256xf32>
    %110 = arith.mulf %107, %109 : vector<8x256xf32>
    %111 = arith.addf %99, %110 : vector<8x256xf32>
    %c6_i32 = arith.constant 6 : i32
    %112 = tpu.dynamic_rotate %96 by %c6_i32 dim 1 : vector<8x256xf32>, i32 -> vector<8x256xf32>
    %c1 = arith.constant 1 : index
    %c0_54 = arith.constant 0 : index
    %113 = vector.load %arg4[%c1, %c0_54] : memref<15x256xf32, #tpu.memory_space<vmem>>, vector<1x256xf32>
    %cst_55 = arith.constant 0.000000e+00 : f32
    %114 = vector.broadcast %cst_55 : f32 to vector<1x256xf32>
    %115 = arith.cmpf one, %113, %114 : vector<1x256xf32>
    %cst_56 = arith.constant 0.000000e+00 : f32
    %116 = vector.shape_cast %115 : vector<1x256xi1> to vector<1x256xi1>
    %117 = vector.broadcast %116 : vector<1x256xi1> to vector<8x256xi1>
    %118 = vector.broadcast %cst_56 : f32 to vector<8x256xf32>
    %119 = arith.select %117, %112, %118 : vector<8x256xi1>, vector<8x256xf32>
    %c8_57 = arith.constant 8 : index
    %c1_58 = arith.constant 1 : index
    %120 = vector.load %arg3[%c8_57, %c1_58] : memref<16x15xf32, #tpu.memory_space<vmem>>, vector<8x1xf32>
    %121 = vector.broadcast %120 : vector<8x1xf32> to vector<8x256xf32>
    %122 = arith.mulf %119, %121 : vector<8x256xf32>
    %123 = arith.addf %111, %122 : vector<8x256xf32>
    %c5_i32 = arith.constant 5 : i32
    %124 = tpu.dynamic_rotate %96 by %c5_i32 dim 1 : vector<8x256xf32>, i32 -> vector<8x256xf32>
    %c2 = arith.constant 2 : index
    %c0_59 = arith.constant 0 : index
    %125 = vector.load %arg4[%c2, %c0_59] : memref<15x256xf32, #tpu.memory_space<vmem>>, vector<1x256xf32>
    %cst_60 = arith.constant 0.000000e+00 : f32
    %126 = vector.broadcast %cst_60 : f32 to vector<1x256xf32>
    %127 = arith.cmpf one, %125, %126 : vector<1x256xf32>
    %cst_61 = arith.constant 0.000000e+00 : f32
    %128 = vector.shape_cast %127 : vector<1x256xi1> to vector<1x256xi1>
    %129 = vector.broadcast %128 : vector<1x256xi1> to vector<8x256xi1>
    %130 = vector.broadcast %cst_61 : f32 to vector<8x256xf32>
    %131 = arith.select %129, %124, %130 : vector<8x256xi1>, vector<8x256xf32>
    %c8_62 = arith.constant 8 : index
    %c2_63 = arith.constant 2 : index
    %132 = vector.load %arg3[%c8_62, %c2_63] : memref<16x15xf32, #tpu.memory_space<vmem>>, vector<8x1xf32>
    %133 = vector.broadcast %132 : vector<8x1xf32> to vector<8x256xf32>
    %134 = arith.mulf %131, %133 : vector<8x256xf32>
    %135 = arith.addf %123, %134 : vector<8x256xf32>
    %c4_i32 = arith.constant 4 : i32
    %136 = tpu.dynamic_rotate %96 by %c4_i32 dim 1 : vector<8x256xf32>, i32 -> vector<8x256xf32>
    %c3 = arith.constant 3 : index
    %c0_64 = arith.constant 0 : index
    %137 = vector.load %arg4[%c3, %c0_64] : memref<15x256xf32, #tpu.memory_space<vmem>>, vector<1x256xf32>
    %cst_65 = arith.constant 0.000000e+00 : f32
    %138 = vector.broadcast %cst_65 : f32 to vector<1x256xf32>
    %139 = arith.cmpf one, %137, %138 : vector<1x256xf32>
    %cst_66 = arith.constant 0.000000e+00 : f32
    %140 = vector.shape_cast %139 : vector<1x256xi1> to vector<1x256xi1>
    %141 = vector.broadcast %140 : vector<1x256xi1> to vector<8x256xi1>
    %142 = vector.broadcast %cst_66 : f32 to vector<8x256xf32>
    %143 = arith.select %141, %136, %142 : vector<8x256xi1>, vector<8x256xf32>
    %c8_67 = arith.constant 8 : index
    %c3_68 = arith.constant 3 : index
    %144 = vector.load %arg3[%c8_67, %c3_68] : memref<16x15xf32, #tpu.memory_space<vmem>>, vector<8x1xf32>
    %145 = vector.broadcast %144 : vector<8x1xf32> to vector<8x256xf32>
    %146 = arith.mulf %143, %145 : vector<8x256xf32>
    %147 = arith.addf %135, %146 : vector<8x256xf32>
    %c3_i32_69 = arith.constant 3 : i32
    %148 = tpu.dynamic_rotate %96 by %c3_i32_69 dim 1 : vector<8x256xf32>, i32 -> vector<8x256xf32>
    %c4_70 = arith.constant 4 : index
    %c0_71 = arith.constant 0 : index
    %149 = vector.load %arg4[%c4_70, %c0_71] : memref<15x256xf32, #tpu.memory_space<vmem>>, vector<1x256xf32>
    %cst_72 = arith.constant 0.000000e+00 : f32
    %150 = vector.broadcast %cst_72 : f32 to vector<1x256xf32>
    %151 = arith.cmpf one, %149, %150 : vector<1x256xf32>
    %cst_73 = arith.constant 0.000000e+00 : f32
    %152 = vector.shape_cast %151 : vector<1x256xi1> to vector<1x256xi1>
    %153 = vector.broadcast %152 : vector<1x256xi1> to vector<8x256xi1>
    %154 = vector.broadcast %cst_73 : f32 to vector<8x256xf32>
    %155 = arith.select %153, %148, %154 : vector<8x256xi1>, vector<8x256xf32>
    %c8_74 = arith.constant 8 : index
    %c4_75 = arith.constant 4 : index
    %156 = vector.load %arg3[%c8_74, %c4_75] : memref<16x15xf32, #tpu.memory_space<vmem>>, vector<8x1xf32>
    %157 = vector.broadcast %156 : vector<8x1xf32> to vector<8x256xf32>
    %158 = arith.mulf %155, %157 : vector<8x256xf32>
    %159 = arith.addf %147, %158 : vector<8x256xf32>
    %c2_i32_76 = arith.constant 2 : i32
    %160 = tpu.dynamic_rotate %96 by %c2_i32_76 dim 1 : vector<8x256xf32>, i32 -> vector<8x256xf32>
    %c5_77 = arith.constant 5 : index
    %c0_78 = arith.constant 0 : index
    %161 = vector.load %arg4[%c5_77, %c0_78] : memref<15x256xf32, #tpu.memory_space<vmem>>, vector<1x256xf32>
    %cst_79 = arith.constant 0.000000e+00 : f32
    %162 = vector.broadcast %cst_79 : f32 to vector<1x256xf32>
    %163 = arith.cmpf one, %161, %162 : vector<1x256xf32>
    %cst_80 = arith.constant 0.000000e+00 : f32
    %164 = vector.shape_cast %163 : vector<1x256xi1> to vector<1x256xi1>
    %165 = vector.broadcast %164 : vector<1x256xi1> to vector<8x256xi1>
    %166 = vector.broadcast %cst_80 : f32 to vector<8x256xf32>
    %167 = arith.select %165, %160, %166 : vector<8x256xi1>, vector<8x256xf32>
    %c8_81 = arith.constant 8 : index
    %c5_82 = arith.constant 5 : index
    %168 = vector.load %arg3[%c8_81, %c5_82] : memref<16x15xf32, #tpu.memory_space<vmem>>, vector<8x1xf32>
    %169 = vector.broadcast %168 : vector<8x1xf32> to vector<8x256xf32>
    %170 = arith.mulf %167, %169 : vector<8x256xf32>
    %171 = arith.addf %159, %170 : vector<8x256xf32>
    %c1_i32_83 = arith.constant 1 : i32
    %172 = tpu.dynamic_rotate %96 by %c1_i32_83 dim 1 : vector<8x256xf32>, i32 -> vector<8x256xf32>
    %c6_84 = arith.constant 6 : index
    %c0_85 = arith.constant 0 : index
    %173 = vector.load %arg4[%c6_84, %c0_85] : memref<15x256xf32, #tpu.memory_space<vmem>>, vector<1x256xf32>
    %cst_86 = arith.constant 0.000000e+00 : f32
    %174 = vector.broadcast %cst_86 : f32 to vector<1x256xf32>
    %175 = arith.cmpf one, %173, %174 : vector<1x256xf32>
    %cst_87 = arith.constant 0.000000e+00 : f32
    %176 = vector.shape_cast %175 : vector<1x256xi1> to vector<1x256xi1>
    %177 = vector.broadcast %176 : vector<1x256xi1> to vector<8x256xi1>
    %178 = vector.broadcast %cst_87 : f32 to vector<8x256xf32>
    %179 = arith.select %177, %172, %178 : vector<8x256xi1>, vector<8x256xf32>
    %c8_88 = arith.constant 8 : index
    %c6_89 = arith.constant 6 : index
    %180 = vector.load %arg3[%c8_88, %c6_89] : memref<16x15xf32, #tpu.memory_space<vmem>>, vector<8x1xf32>
    %181 = vector.broadcast %180 : vector<8x1xf32> to vector<8x256xf32>
    %182 = arith.mulf %179, %181 : vector<8x256xf32>
    %183 = arith.addf %171, %182 : vector<8x256xf32>
    %c7_90 = arith.constant 7 : index
    %c0_91 = arith.constant 0 : index
    %184 = vector.load %arg4[%c7_90, %c0_91] : memref<15x256xf32, #tpu.memory_space<vmem>>, vector<1x256xf32>
    %cst_92 = arith.constant 0.000000e+00 : f32
    %185 = vector.broadcast %cst_92 : f32 to vector<1x256xf32>
    %186 = arith.cmpf one, %184, %185 : vector<1x256xf32>
    %cst_93 = arith.constant 0.000000e+00 : f32
    %187 = vector.shape_cast %186 : vector<1x256xi1> to vector<1x256xi1>
    %188 = vector.broadcast %187 : vector<1x256xi1> to vector<8x256xi1>
    %189 = vector.broadcast %cst_93 : f32 to vector<8x256xf32>
    %190 = arith.select %188, %96, %189 : vector<8x256xi1>, vector<8x256xf32>
    %c8_94 = arith.constant 8 : index
    %c7_95 = arith.constant 7 : index
    %191 = vector.load %arg3[%c8_94, %c7_95] : memref<16x15xf32, #tpu.memory_space<vmem>>, vector<8x1xf32>
    %192 = vector.broadcast %191 : vector<8x1xf32> to vector<8x256xf32>
    %193 = arith.mulf %190, %192 : vector<8x256xf32>
    %194 = arith.addf %183, %193 : vector<8x256xf32>
    %c255_i32_96 = arith.constant 255 : i32
    %195 = tpu.dynamic_rotate %96 by %c255_i32_96 dim 1 : vector<8x256xf32>, i32 -> vector<8x256xf32>
    %c8_97 = arith.constant 8 : index
    %c0_98 = arith.constant 0 : index
    %196 = vector.load %arg4[%c8_97, %c0_98] : memref<15x256xf32, #tpu.memory_space<vmem>>, vector<1x256xf32>
    %cst_99 = arith.constant 0.000000e+00 : f32
    %197 = vector.broadcast %cst_99 : f32 to vector<1x256xf32>
    %198 = arith.cmpf one, %196, %197 : vector<1x256xf32>
    %cst_100 = arith.constant 0.000000e+00 : f32
    %199 = vector.shape_cast %198 : vector<1x256xi1> to vector<1x256xi1>
    %200 = vector.broadcast %199 : vector<1x256xi1> to vector<8x256xi1>
    %201 = vector.broadcast %cst_100 : f32 to vector<8x256xf32>
    %202 = arith.select %200, %195, %201 : vector<8x256xi1>, vector<8x256xf32>
    %c8_101 = arith.constant 8 : index
    %c8_102 = arith.constant 8 : index
    %203 = vector.load %arg3[%c8_101, %c8_102] : memref<16x15xf32, #tpu.memory_space<vmem>>, vector<8x1xf32>
    %204 = vector.broadcast %203 : vector<8x1xf32> to vector<8x256xf32>
    %205 = arith.mulf %202, %204 : vector<8x256xf32>
    %206 = arith.addf %194, %205 : vector<8x256xf32>
    %c254_i32_103 = arith.constant 254 : i32
    %207 = tpu.dynamic_rotate %96 by %c254_i32_103 dim 1 : vector<8x256xf32>, i32 -> vector<8x256xf32>
    %c9_104 = arith.constant 9 : index
    %c0_105 = arith.constant 0 : index
    %208 = vector.load %arg4[%c9_104, %c0_105] : memref<15x256xf32, #tpu.memory_space<vmem>>, vector<1x256xf32>
    %cst_106 = arith.constant 0.000000e+00 : f32
    %209 = vector.broadcast %cst_106 : f32 to vector<1x256xf32>
    %210 = arith.cmpf one, %208, %209 : vector<1x256xf32>
    %cst_107 = arith.constant 0.000000e+00 : f32
    %211 = vector.shape_cast %210 : vector<1x256xi1> to vector<1x256xi1>
    %212 = vector.broadcast %211 : vector<1x256xi1> to vector<8x256xi1>
    %213 = vector.broadcast %cst_107 : f32 to vector<8x256xf32>
    %214 = arith.select %212, %207, %213 : vector<8x256xi1>, vector<8x256xf32>
    %c8_108 = arith.constant 8 : index
    %c9_109 = arith.constant 9 : index
    %215 = vector.load %arg3[%c8_108, %c9_109] : memref<16x15xf32, #tpu.memory_space<vmem>>, vector<8x1xf32>
    %216 = vector.broadcast %215 : vector<8x1xf32> to vector<8x256xf32>
    %217 = arith.mulf %214, %216 : vector<8x256xf32>
    %218 = arith.addf %206, %217 : vector<8x256xf32>
    %c253_i32_110 = arith.constant 253 : i32
    %219 = tpu.dynamic_rotate %96 by %c253_i32_110 dim 1 : vector<8x256xf32>, i32 -> vector<8x256xf32>
    %c10_111 = arith.constant 10 : index
    %c0_112 = arith.constant 0 : index
    %220 = vector.load %arg4[%c10_111, %c0_112] : memref<15x256xf32, #tpu.memory_space<vmem>>, vector<1x256xf32>
    %cst_113 = arith.constant 0.000000e+00 : f32
    %221 = vector.broadcast %cst_113 : f32 to vector<1x256xf32>
    %222 = arith.cmpf one, %220, %221 : vector<1x256xf32>
    %cst_114 = arith.constant 0.000000e+00 : f32
    %223 = vector.shape_cast %222 : vector<1x256xi1> to vector<1x256xi1>
    %224 = vector.broadcast %223 : vector<1x256xi1> to vector<8x256xi1>
    %225 = vector.broadcast %cst_114 : f32 to vector<8x256xf32>
    %226 = arith.select %224, %219, %225 : vector<8x256xi1>, vector<8x256xf32>
    %c8_115 = arith.constant 8 : index
    %c10_116 = arith.constant 10 : index
    %227 = vector.load %arg3[%c8_115, %c10_116] : memref<16x15xf32, #tpu.memory_space<vmem>>, vector<8x1xf32>
    %228 = vector.broadcast %227 : vector<8x1xf32> to vector<8x256xf32>
    %229 = arith.mulf %226, %228 : vector<8x256xf32>
    %230 = arith.addf %218, %229 : vector<8x256xf32>
    %c252_i32 = arith.constant 252 : i32
    %231 = tpu.dynamic_rotate %96 by %c252_i32 dim 1 : vector<8x256xf32>, i32 -> vector<8x256xf32>
    %c11 = arith.constant 11 : index
    %c0_117 = arith.constant 0 : index
    %232 = vector.load %arg4[%c11, %c0_117] : memref<15x256xf32, #tpu.memory_space<vmem>>, vector<1x256xf32>
    %cst_118 = arith.constant 0.000000e+00 : f32
    %233 = vector.broadcast %cst_118 : f32 to vector<1x256xf32>
    %234 = arith.cmpf one, %232, %233 : vector<1x256xf32>
    %cst_119 = arith.constant 0.000000e+00 : f32
    %235 = vector.shape_cast %234 : vector<1x256xi1> to vector<1x256xi1>
    %236 = vector.broadcast %235 : vector<1x256xi1> to vector<8x256xi1>
    %237 = vector.broadcast %cst_119 : f32 to vector<8x256xf32>
    %238 = arith.select %236, %231, %237 : vector<8x256xi1>, vector<8x256xf32>
    %c8_120 = arith.constant 8 : index
    %c11_121 = arith.constant 11 : index
    %239 = vector.load %arg3[%c8_120, %c11_121] : memref<16x15xf32, #tpu.memory_space<vmem>>, vector<8x1xf32>
    %240 = vector.broadcast %239 : vector<8x1xf32> to vector<8x256xf32>
    %241 = arith.mulf %238, %240 : vector<8x256xf32>
    %242 = arith.addf %230, %241 : vector<8x256xf32>
    %c251_i32 = arith.constant 251 : i32
    %243 = tpu.dynamic_rotate %96 by %c251_i32 dim 1 : vector<8x256xf32>, i32 -> vector<8x256xf32>
    %c12 = arith.constant 12 : index
    %c0_122 = arith.constant 0 : index
    %244 = vector.load %arg4[%c12, %c0_122] : memref<15x256xf32, #tpu.memory_space<vmem>>, vector<1x256xf32>
    %cst_123 = arith.constant 0.000000e+00 : f32
    %245 = vector.broadcast %cst_123 : f32 to vector<1x256xf32>
    %246 = arith.cmpf one, %244, %245 : vector<1x256xf32>
    %cst_124 = arith.constant 0.000000e+00 : f32
    %247 = vector.shape_cast %246 : vector<1x256xi1> to vector<1x256xi1>
    %248 = vector.broadcast %247 : vector<1x256xi1> to vector<8x256xi1>
    %249 = vector.broadcast %cst_124 : f32 to vector<8x256xf32>
    %250 = arith.select %248, %243, %249 : vector<8x256xi1>, vector<8x256xf32>
    %c8_125 = arith.constant 8 : index
    %c12_126 = arith.constant 12 : index
    %251 = vector.load %arg3[%c8_125, %c12_126] : memref<16x15xf32, #tpu.memory_space<vmem>>, vector<8x1xf32>
    %252 = vector.broadcast %251 : vector<8x1xf32> to vector<8x256xf32>
    %253 = arith.mulf %250, %252 : vector<8x256xf32>
    %254 = arith.addf %242, %253 : vector<8x256xf32>
    %c250_i32 = arith.constant 250 : i32
    %255 = tpu.dynamic_rotate %96 by %c250_i32 dim 1 : vector<8x256xf32>, i32 -> vector<8x256xf32>
    %c13 = arith.constant 13 : index
    %c0_127 = arith.constant 0 : index
    %256 = vector.load %arg4[%c13, %c0_127] : memref<15x256xf32, #tpu.memory_space<vmem>>, vector<1x256xf32>
    %cst_128 = arith.constant 0.000000e+00 : f32
    %257 = vector.broadcast %cst_128 : f32 to vector<1x256xf32>
    %258 = arith.cmpf one, %256, %257 : vector<1x256xf32>
    %cst_129 = arith.constant 0.000000e+00 : f32
    %259 = vector.shape_cast %258 : vector<1x256xi1> to vector<1x256xi1>
    %260 = vector.broadcast %259 : vector<1x256xi1> to vector<8x256xi1>
    %261 = vector.broadcast %cst_129 : f32 to vector<8x256xf32>
    %262 = arith.select %260, %255, %261 : vector<8x256xi1>, vector<8x256xf32>
    %c8_130 = arith.constant 8 : index
    %c13_131 = arith.constant 13 : index
    %263 = vector.load %arg3[%c8_130, %c13_131] : memref<16x15xf32, #tpu.memory_space<vmem>>, vector<8x1xf32>
    %264 = vector.broadcast %263 : vector<8x1xf32> to vector<8x256xf32>
    %265 = arith.mulf %262, %264 : vector<8x256xf32>
    %266 = arith.addf %254, %265 : vector<8x256xf32>
    %c249_i32 = arith.constant 249 : i32
    %267 = tpu.dynamic_rotate %96 by %c249_i32 dim 1 : vector<8x256xf32>, i32 -> vector<8x256xf32>
    %c14 = arith.constant 14 : index
    %c0_132 = arith.constant 0 : index
    %268 = vector.load %arg4[%c14, %c0_132] : memref<15x256xf32, #tpu.memory_space<vmem>>, vector<1x256xf32>
    %cst_133 = arith.constant 0.000000e+00 : f32
    %269 = vector.broadcast %cst_133 : f32 to vector<1x256xf32>
    %270 = arith.cmpf one, %268, %269 : vector<1x256xf32>
    %cst_134 = arith.constant 0.000000e+00 : f32
    %271 = vector.shape_cast %270 : vector<1x256xi1> to vector<1x256xi1>
    %272 = vector.broadcast %271 : vector<1x256xi1> to vector<8x256xi1>
    %273 = vector.broadcast %cst_134 : f32 to vector<8x256xf32>
    %274 = arith.select %272, %267, %273 : vector<8x256xi1>, vector<8x256xf32>
    %c8_135 = arith.constant 8 : index
    %c14_136 = arith.constant 14 : index
    %275 = vector.load %arg3[%c8_135, %c14_136] : memref<16x15xf32, #tpu.memory_space<vmem>>, vector<8x1xf32>
    %276 = vector.broadcast %275 : vector<8x1xf32> to vector<8x256xf32>
    %277 = arith.mulf %274, %276 : vector<8x256xf32>
    %278 = arith.addf %266, %277 : vector<8x256xf32>
    %cst_137 = arith.constant 0.000000e+00 : f32
    %cst_138 = arith.constant 6.000000e+00 : f32
    %279 = vector.broadcast %cst_137 : f32 to vector<8x256xf32>
    %280 = arith.maximumf %279, %278 : vector<8x256xf32>
    %281 = vector.broadcast %cst_138 : f32 to vector<8x256xf32>
    %282 = arith.minimumf %281, %280 : vector<8x256xf32>
    %c0_139 = arith.constant 0 : index
    %c8_140 = arith.constant 8 : index
    %c0_141 = arith.constant 0 : index
    %283 = vector.load %arg6[%c0_139, %c8_140, %c0_141] : memref<1x16x256xf32, #tpu.memory_space<vmem>>, vector<1x8x256xf32>
    %284 = vector.shape_cast %283 : vector<1x8x256xf32> to vector<8x256xf32>
    %285 = vector.shape_cast %282 : vector<8x256xf32> to vector<1x8x256xf32>
    tpu.vector_store %arg6[%c0_139, %c8_140, %c0_141], %285 {strides = array<i32>} : memref<1x16x256xf32, #tpu.memory_space<vmem>>, vector<1x8x256xf32>,
    return
  }
  func.func @transform_0(%arg0: i32, %arg1: i32) -> (i32, i32, i32) {
    %c0_i32 = arith.constant 0 : i32
    %c0_i32_0 = arith.constant 0 : i32
    return %arg0, %c0_i32, %arg1 : i32, i32, i32
  }
  func.func @transform_1(%arg0: i32, %arg1: i32) -> (i32, i32) {
    %c0_i32 = arith.constant 0 : i32
    %c0_i32_0 = arith.constant 0 : i32
    %c0_i32_1 = arith.constant 0 : i32
    return %c0_i32, %c0_i32_0 : i32, i32
  }
  func.func @transform_2(%arg0: i32, %arg1: i32) -> (i32, i32) {
    %c0_i32 = arith.constant 0 : i32
    %c0_i32_0 = arith.constant 0 : i32
    %c0_i32_1 = arith.constant 0 : i32
    return %c0_i32, %c0_i32_0 : i32, i32
  }
  func.func @transform_3(%arg0: i32, %arg1: i32) -> (i32, i32) {
    %c0_i32 = arith.constant 0 : i32
    %c0_i32_0 = arith.constant 0 : i32
    %c0_i32_1 = arith.constant 0 : i32
    return %c0_i32, %c0_i32_0 : i32, i32
  }
  func.func @transform_4(%arg0: i32, %arg1: i32) -> (i32, i32, i32) {
    %c0_i32 = arith.constant 0 : i32
    %c0_i32_0 = arith.constant 0 : i32
    return %arg0, %c0_i32, %arg1 : i32, i32, i32
  }
}

</mosaic_0001>

<bundles_post_ra>
// kernel: tpu_custom_call.1
= control target key start
LH: loop header
LB: loop body
LE: loop exit
PB: predicated region body
PF: predicated region fallthrough
CT: control target
= control target key end

     0   :  { %s2241_s0 = inlined_call_operand.hbm [shape: f32[2,16,256], index: 0, kind: input, shape index: {}]   ;;  %s2242_s1 = inlined_call_operand.vmem [shape: f32[16,15], index: 1, kind: input, shape index: {}]   ;;  %s2243_s2 = inlined_call_operand.hbm [shape: f32[15,256], index: 2, kind: input, shape index: {}]   ;;  %s2244_s3 = inlined_call_operand.vmem [shape: f32[16,1], index: 3, kind: input, shape index: {}]   ;;  %s2245_s4 = inlined_call_operand.hbm [shape: f32[2,16,256], index: 4, kind: output, shape index: {}]  }
   0x1   :  { %2251 = sst [smem:[#allocation11_spill]] %s2243_s2 }
   0x2   :  { %9 = vsyncpa [#allocation3], 0 }
   0x3   :  { %11 = vsyncpa [#allocation3 + $0x1], 0 }
   0x4   :  { %12 = vsyncpa [#allocation6], 0 }
   0x5   :  { %13 = vsyncpa [#allocation4], 0 }
   0x6   :  { %15 = vsyncpa [#allocation4 + $0x1], 0  ;;  %s1399_s15 = smov 0   ;;  %s1401_s16 = smov 0  }
   0x7   :  { %s1403_s17 = smov 0   ;;  %s1405_s18 = smov 0  }
   0x8   :  { %s1407_s19 = smov 0   ;;  %s1409_s20 = smov 0  }
   0x9 LB: > { %s1052_s21 = sadd.s32 4294967295, %s1336_s20   ;;  %s1053_s22 = sadd.s32 4294967294, %s1336_s20   ;;  %s1336_s20 = sphi %s1409_s20, %s21_s20   ;;  %s1332_s19 = sphi %s1407_s19, %s2373_s19   ;;  %s1328_s18 = sphi %s1405_s18, %s2372_s18   ;;  %s1324_s17 = sphi %s1403_s17, %s2371_s17   ;;  %s1320_s16 = sphi %s1401_s16, %s2370_s16   ;;  %s1316_s15 = sphi %s1399_s15, %s2369_s15  }
   0xa   : > { %p55_p0 = scmp.ne.s32.totalorder %s1320_s16, %s1316_s15  ;;  %p1433_p1 = scmp.eq.s32.totalorder %s1052_s21, 0 }
   0xb   : > { %p1437_p2 = scmp.eq.s32.totalorder %s1052_s21, 1  ;;  %p150_p3 = scmp.eq.s32.totalorder %s1053_s22, 1 }
   0xc   : > { %p1443_p4 = por %p1433_p1, %p55_p0  ;;  %p1054_p5 = scmp.ge.s32.totalorder %s1336_s20, 1 }
   0xd   : > { %p1448_p6 = por %p150_p3, %p55_p0  ;;  %p157_p7 = scmp.lt.s32.totalorder %s1336_s20, 3 }
   0xe   : > { %s2254_s25 = scalar_select %p1443_p4, 1, 0 }
   0xf   : > { %s2255_s26 = scalar_select %p1448_p6, 1, 0 }
  0x10   : > { %p1453_p8 = pnand %p1054_p5, %p157_p7  ;;  %s1338_s28 = smov [#allocation5]  }
  0x11   : > { %s172_s29 = sshll.u32 %s1338_s28, 4  ;;  %s33_s5 = sadd.s32 1, %s1332_s19  ;;  %s173_s29 = int_to_ptr.vmem [resolvable:$true] %s172_s29 }
  0x12   : > { %p1079_p9 = pneg %p1453_p8  ;;  %s1209_s6 = scalar_lea.vmem %s173_s29, 512 }
  0x13   : > { %p1210_p13 = scmp.ne.s32.totalorder %s173_s29, %s1209_s6  ;;  %p1217_p5 = scmp.lt.s32.totalorder %s173_s29, %s173_s29 }
  0x14   : > { %p1462_p11 = pnand %p1079_p9, %p1433_p1  ;;  %p1218_p7 = scmp.lt.s32.totalorder %s1209_s6, %s1209_s6 }
  0x16   : > { %p1200_p12 = pneg %p1462_p11  ;;  %p1219_p6 = por %p1218_p7, %p1217_p5 }
  0x18   : > { %p1212_p0 = pnand %p1210_p13, %p1200_p12 }
  0x1a   : > { %p1213_p3 = pneg %p1212_p0 }
  0x1c   : > { %p1220_p4 = pnand %p1219_p6, %p1213_p3 }
  0x1e   : > { %1223 = shalt.err (!%p1220_p4)
}
  0x1f   : > { %s2247_s7 = smov 256   ;;  %s2248_s8 = smov 16  }
  0x20   : > { %s2258_s2 = sld [smem:[#allocation11_spill]]  ;;  %p35_p4 = scmp.ge.s32.totalorder %s33_s5, 2 }
  0x21   : > { %s42_s11 = sadd.s32 1, %s1324_s17  ;;  %p49_p6 = scmp.ne.s32.totalorder %s1324_s17, %s1320_s16 }
  0x22   : > { %p50_p9 = scmp.eq.s32.totalorder %s1336_s20, 0  ;;  %s2375_s5 = smov (%p35_p4, %s33_s5), 0 }
  0x23   : > { %p1489_p13 = por %p1437_p2, %p49_p6  ;;  %s37_s14 = ssub.s32 %s1332_s19, %s2375_s5 }
  0x24   : > { %p1483_p12 = por %p50_p9, %p49_p6  ;;  %p1092_p0 = scmp.lt.s32.totalorder %s1336_s20, 2 }
  0x25   : > { %s189_s21 = sand.u32 1, %s1324_s17  }
  0x26   : > { %1082 = dma.hbm_to_vmem [thread:$0]  (!%p1462_p11), %s2258_s2, 512, %s173_s29, [#allocation6], %s2247_s7, %s2247_s7, %s2248_s8  }
  0x27   : > { %p40_p11 = scmp.eq.s32.totalorder %s37_s14, 0  ;;  %s1057_s22 = sshll.u32 %s189_s21, 5 }
  0x28   : > { %s1069_s29 = sshll.u32 %s1332_s19, 9  ;;  %s193_s10 = scalar_lea.vmem [#allocation2], %s1057_s22 }
  0x29   : > { %s1498_s28 = scalar_select %p40_p11, %s1324_s17, %s42_s11  }
  0x2a   : > { %s201_s9 = scalar_lea.hbm %s2241_s0, %s1069_s29  ;;  %s202_s7 = sshll.u32 %s193_s10, 4  ;;  %s203_s7 = int_to_ptr.vmem [resolvable:$true] %s202_s7 }
  0x2b   : > { %p1506_p2 = pnand %p1092_p0, %p1483_p12  ;;  %s190_s8 = scalar_lea.sflag [#allocation3], %s189_s21 }
  0x2c   : > { %s1237_s14 = scalar_lea.vmem %s203_s7, 512  ;;  %s1341_s11 = smov [#allocation2]  }
  0x2d   : > { %p1226_p3 = pneg %p1506_p2  ;;  %p1238_p5 = scmp.ne.s32.totalorder %s203_s7, %s1237_s14 }
  0x2e   : > { %s1242_s2 = sshll.u32 %s1341_s11, 4  ;;  %s1243_s2 = int_to_ptr.vmem [resolvable:$false] %s1242_s2 }
  0x2f   : > { %p1240_p7 = pnand %p1238_p5, %p1226_p3  ;;  %s1244_s29 = scalar_lea.vmem %s1243_s2, 1024 }
  0x30   : > { %p1245_p6 = scmp.lt.s32.totalorder %s203_s7, %s1243_s2  ;;  %p1246_p9 = scmp.lt.s32.totalorder %s1244_s29, %s1237_s14 }
  0x31   : > { %p1241_p4 = pneg %p1240_p7 }
  0x32   : > { %p1247_p11 = por %p1246_p9, %p1245_p6 }
  0x34   : > { %p1248_p10 = pnand %p1247_p11, %p1241_p4 }
  0x36   : > { %1251 = shalt.err (!%p1248_p10)
}
  0x37   : > { %s2262_s12 = smov 16   ;;  %s2263_s22 = smov 256  }
  0x38   : > { %1086 = dma.hbm_to_vmem [thread:$0]  (!%p1506_p2), %s201_s9, 512, %s203_s7, %s190_s8, %s2263_s22, %s2263_s22, %s2262_s12  }
  0x39   : > { %214 = sbr.rel (%p1453_p8) target bundleno = 368 (0x170), region = 36  ;;  %s1520_s21 = sand.u32 (!%p1453_p8), 1, %s1320_s16  }
  0x3a   : > { %s1061_s2 = sshll.u32 (!%p1453_p8), %s1520_s21, 5  ;;  %s217_s30 = scalar_lea.sflag (!%p1453_p8), [#allocation3], %s1520_s21 }
  0x3b   : > { %s1526_s6 = scalar_lea.vmem (!%p1453_p8), [#allocation2], %s1061_s2  ;;  %p2264_p10 = scmp.ne.s32.totalorder (!%p1453_p8), %s2254_s25, 0 }
  0x3e   : > { %1303 = dma.done.wait (%p2264_p10), %s217_s30, 512  }
  0x3f   : > { %1305 = vsyncadd (%p2264_p10), %s217_s30, 4294966784 }
  0x40   : > { %1307 = dma.done.wait (%p1433_p1), [#allocation6], 512  }
  0x41   : > { %1309 = vsyncadd (%p1433_p1), [#allocation6], 4294966784  ;;  %v1342_v0 = vmov 0   ;;  %v1343_v1 = vmov 4   ;;  %v253_v2 = vld [vmem:[%s2244_s3] sm:$0xff]  ;;  %v1542_v3 = vld [vmem:[%s1526_s6 + $0x8] sm:$0xff]  ;;  %v263_v37 = vlaneseq }
  0x42   : > { %1177 = vset.pattern.permute.xlu0 %v1342_v0  ;;  %1178 = vset.pattern.permute.xlu1 %v1343_v1  ;;  %s1344_s25 = smov 3   ;;  %v284_v4 = vld [vmem:[%s2242_s1] sm:$0xff]  ;;  %v1345_v6 = vmov 9   ;;  %s1346_s9 = smov 2   ;;  %v1347_v7 = vmov 7   ;;  %v1351_v8 = vmov 10  }
  0x43   : > { %256 = vperm.xlu0 %1177, %v253_v2   ;;  %261 = vrot.lane.b32.xlu1 %v1542_v3, %s1344_s25  ;;  %v1550_v5 = vld [vmem:[%s1526_s6] sm:$0xff]  ;;  %s1348_s10 = smov 1   ;;  %s1349_s24 = smov 127   ;;  %v1352_v9 = vmov 8   ;;  %v1571_v10 = vld [vmem:[%s1526_s6 + $0x18] sm:$0xff]  ;;  %v1575_v11 = vld [vmem:[%s1526_s6 + $0x10] sm:$0xff] }
  0x44   : > { %s1350_s14 = smov 126   ;;  %s1353_s11 = smov 7   ;;  %v1354_v12 = vmov 1   ;;  %v509_v13 = vld [vmem:[%s2242_s1 + $0x8] sm:$0xff]  ;;  %v1357_v14 = vmov 2   ;;  %v1358_v16 = vmov 5  }
  0x45   : > { %s1355_s29 = smov 6   ;;  %s1356_s30 = smov 125   ;;  %v481_v15 = vld [vmem:[%s2244_s3 + $0x8] sm:$0xff]  ;;  %v1360_v17 = vmov 3   ;;  %v1361_v18 = vmov 6   ;;  %v1363_v19 = vmov 11  }
  0x46   : > { %s1359_s7 = smov 4   ;;  %s1362_s23 = smov 5   ;;  %v1364_v20 = vmov 12   ;;  %v1365_v21 = vmov 13   ;;  %v1366_v22 = vmov 14   ;;  %v273_v42 = vshrl.u32 %v263_v37, 7 }
  0x47   : > { %287 = vperm.xlu1 %1178, %v284_v4   ;;  %259 = vrot.lane.b32.xlu0 %v1550_v5, %s1344_s25  ;;  %s1368_s8 = smov 124   ;;  %v357_v38 = vld [vmem:[#allocation5 + $0x7] ss:$8 sm:$0x3]  ;;  %v1675_v50 = vand.u32 127, %v263_v37  ;;  %s940_s22 = scalar_lea.sflag [#allocation4], %s1520_s21 }
  0x48   : > { %1181 = vset.pattern.permute.xlu0 %v1345_v6  ;;  %v269_v40 = vld [vmem:[#allocation5 + $0x4] ss:$8 sm:$0x3]  ;;  %vm358_vm0 = vcmp.ne.f32.partialorder %v357_v38, 0.0  ;;  %v1671_v48 = vsub.s32 0, %v273_v42  ;;  %v1673_v49 = vsub.s32 1, %v273_v42 }
  0x49   : > { %v302_v43 = vld [vmem:[#allocation5 + $0x5] ss:$8 sm:$0x3]  ;;  %vm270_vm1 = vcmp.ne.f32.partialorder %v269_v40, 0.0  ;;  %v359_v45 = vsel %vm358_vm0, 1, %v1342_v0  ;;  %vm2249_vm5 = vcmp.lt.s32.totalorder %v1675_v50, 3 }
  0x4a   : > { %vm303_vm2 = vcmp.ne.f32.partialorder %v302_v43, 0.0  ;;  %v333_v47 = vld [vmem:[#allocation5 + $0x6] ss:$8 sm:$0x3]  ;;  %v271_v51 = vsel %vm270_vm1, 1, %v1342_v0  ;;  %v367_v53 = vrot.slane %v359_v45, %v1673_v49  ;;  %v363_v56 = vrot.slane %v359_v45, %v1671_v48 }
  0x4b   : > { %296 = vrot.lane.b32.xlu1 %v1542_v3, %s1346_s9  ;;  %294 = vrot.lane.b32.xlu0 %v1550_v5, %s1346_s9  ;;  %v494_v52 = vld [vmem:[#allocation5] ss:$8 sm:$0x3]  ;;  %v304_v55 = vsel %vm303_vm2, 1, %v1342_v0  ;;  %vm334_vm3 = vcmp.ne.f32.partialorder %v333_v47, 0.0  ;;  %v275_v60 = vrot.slane %v271_v51, %v1671_v48  ;;  %v279_v61 = vrot.slane %v271_v51, %v1673_v49 }
  0x4c   : > { %1179 = vset.pattern.permute.xlu1 %v1347_v7  ;;  %v388_v57 = vld [vmem:[#allocation5 + $0x10] ss:$8 sm:$0x3]  ;;  %v419_v58 = vld [vmem:[#allocation5 + $0x11] ss:$8 sm:$0x3] }
  0x4d   : > { %v450_v62 = vld [vmem:[#allocation5 + $0x12] ss:$8 sm:$0x3]  ;;  %vm495_vm4 = vcmp.ne.f32.partialorder %v494_v52, 0.0  ;;  %v335_v63 = vsel %vm334_vm3, 1, %v1342_v0  ;;  %vm1689_vm6 = vcmp.eq.s32.totalorder %v367_v53, 1 }
  0x4e   : > { %vm389_vm7 = vcmp.ne.f32.partialorder %v388_v57, 0.0  ;;  %vm2250_vm8 = vcmp.lt.s32.totalorder %v1675_v50, 2  ;;  %vm1698_vm9 = vcmp.eq.s32.totalorder %v363_v56, 1  ;;  %vm420_vm10 = vcmp.ne.f32.partialorder %v419_v58, 0.0 }
  0x4f   : > { %325 = vrot.lane.b32.xlu1 %v1550_v5, %s1348_s10  ;;  %382 = vrot.lane.b32.xlu0 %v1542_v3, %s1349_s24  ;;  %vm451_vm11 = vcmp.ne.f32.partialorder %v450_v62, 0.0  ;;  %vm1703_vm12 = vcmp.eq.s32.totalorder %v275_v60, 1  ;;  %vm1707_vm13 = vcmp.eq.s32.totalorder %v279_v61, 1  ;;  %vm491_vm3 = vcmp.lt.s32.totalorder %v1675_v50, 7 }
  0x53   : > { %327 = vrot.lane.b32.xlu1 %v1542_v3, %s1348_s10  ;;  %411 = vrot.lane.b32.xlu0 %v1550_v5, %s1350_s14 }
  0x57   : > { %373 = vperm.xlu1 %1179, %v284_v4   ;;  %435 = vperm.xlu0 %1181, %v284_v4  }
  0x5b   : > { %380 = vrot.lane.b32.xlu1 %v1550_v5, %s1349_s24  ;;  %1182 = vset.pattern.permute.xlu0 %v1351_v8 }
  0x5c   : > { %466 = vperm.xlu0 %1182, %v284_v4   ;;  %1180 = vset.pattern.permute.xlu1 %v1352_v9 }
  0x5f   : > { %404 = vperm.xlu1 %1180, %v284_v4  }
  0x60   : > { %489 = vrot.lane.b32.xlu0 %v1571_v10, %s1353_s11 }
  0x61   : > { %1184 = vset.pattern.permute.xlu0 %v1354_v12 }
  0x63   : > { %413 = vrot.lane.b32.xlu1 %v1542_v3, %s1350_s14 }
  0x64   : > { %519 = vrot.lane.b32.xlu0 %v1575_v11, %s1355_s29  ;;  %1183 = vset.pattern.permute.xlu1 %v1342_v0 }
  0x67   : > { %442 = vrot.lane.b32.xlu1 %v1550_v5, %s1356_s30 }
  0x68   : > { %543 = vperm.xlu0 %1184, %v509_v13  }
  0x6b   : > { %444 = vrot.lane.b32.xlu1 %v1542_v3, %s1356_s30 }
  0x6c   : > { %1185 = vset.pattern.permute.xlu0 %v1357_v14 }
  0x6d   : > { %574 = vperm.xlu0 %1185, %v509_v13  }
  0x6f   : > { %484 = vperm.xlu1 %1183, %v481_v15   ;;  %v339_v15 = vrot.slane %v335_v63, %v1671_v48 }
  0x71   : > { %1186 = vset.pattern.permute.xlu0 %v1358_v16  ;;  %v343_v16 = vrot.slane %v335_v63, %v1673_v49 }
  0x72   : > { %318 = vperm.xlu0 %1186, %v284_v4  }
  0x73   : > { %487 = vrot.lane.b32.xlu1 %v1575_v11, %s1353_s11 }
  0x76   : > { %581 = vrot.lane.b32.xlu0 %v1575_v11, %s1359_s7 }
  0x77   : > { %512 = vperm.xlu1 %1183, %v509_v13  }
  0x7a   : > { %663 = vperm.xlu0 %1186, %v509_v13  }
  0x7b   : > { %521 = vrot.lane.b32.xlu1 %v1571_v10, %s1355_s29 }
  0x7c   : > { %1187 = vset.pattern.permute.xlu1 %v1360_v17  ;;  %v558_v17 = vld [vmem:[#allocation5 + $0x2] ss:$8 sm:$0x3] }
  0x7d   : > { %vm559_vm2 = vcmp.ne.f32.partialorder %v558_v17, 0.0 }
  0x7e   : > { %1189 = vset.pattern.permute.xlu0 %v1361_v18  ;;  %v371_v18 = vsel %vm1689_vm6, %v1542_v3, 0.0 }
  0x7f   : > { %550 = vrot.lane.b32.xlu1 %v1575_v11, %s1362_s23  ;;  %349 = vperm.xlu0 %1189, %v284_v4   ;;  %v308_v4 = vrot.slane %v304_v55, %v1671_v48 }
  0x81   : > { %vm1726_vm0 = vcmp.eq.s32.totalorder %v308_v4, 1 }
  0x83   : > { %552 = vrot.lane.b32.xlu1 %v1571_v10, %s1362_s23  ;;  %692 = vperm.xlu0 %1189, %v509_v13  }
  0x87   : > { %605 = vperm.xlu1 %1187, %v509_v13   ;;  %1190 = vset.pattern.permute.xlu0 %v1347_v7  ;;  %v527_v7 = vld [vmem:[#allocation5 + $0x1] ss:$8 sm:$0x3] }
  0x88   : > { %715 = vperm.xlu0 %1190, %v509_v13   ;;  %vm528_vm15 = vcmp.ne.f32.partialorder %v527_v7, 0.0 }
  0x89   : > { %v529_v53 = vsel %vm528_vm15, 1, %v1342_v0 }
  0x8a   : > { %v533_v12 = vrot.slane %v529_v53, %v1671_v48 }
  0x8b   : > { %1188 = vset.pattern.permute.xlu1 %v1343_v1 }
  0x8c   : > { %634 = vperm.xlu1 %1188, %v509_v13   ;;  %1191 = vset.pattern.permute.xlu0 %v1352_v9  ;;  %v496_v9 = vsel %vm495_vm4, 1, %v1342_v0  ;;  %vm1748_vm4 = vcmp.eq.s32.totalorder %v339_v15, 1  ;;  %vm1824_vm14 = vcmp.eq.s32.totalorder %v533_v12, 1 }
  0x8d   : > { %744 = vperm.xlu0 %1191, %v509_v13   ;;  %v500_v42 = vrot.slane %v496_v9, %v1671_v48  ;;  %v504_v47 = vrot.slane %v496_v9, %v1673_v49 }
  0x90   : > { %583 = vrot.lane.b32.xlu1 %v1571_v10, %s1359_s7 }
  0x91   : > { %1192 = vset.pattern.permute.xlu1 %v1345_v6  ;;  %724 = vrot.lane.b32.xlu0 %v1571_v10, %s1349_s24  ;;  %v312_v6 = vrot.slane %v304_v55, %v1673_v49 }
  0x92   : > { %1194 = vset.pattern.permute.xlu0 %v1363_v19  ;;  %v390_v19 = vsel %vm389_vm7, 1, %v1342_v0  ;;  %vm1752_vm7 = vcmp.eq.s32.totalorder %v343_v16, 1 }
  0x93   : > { %vm1730_vm1 = vcmp.eq.s32.totalorder %v312_v6, 1  ;;  %v394_v51 = vrot.slane %v390_v19, %v1671_v48  ;;  %v398_v52 = vrot.slane %v390_v19, %v1673_v49  ;;  %v560_v6 = vsel %vm559_vm2, 1, %v1342_v0 }
  0x94   : > { %612 = vrot.lane.b32.xlu1 %v1575_v11, %s1344_s25 }
  0x95   : > { %751 = vrot.lane.b32.xlu0 %v1575_v11, %s1350_s14  ;;  %vm1783_vm2 = vcmp.eq.s32.totalorder %v394_v51, 1 }
  0x98   : > { %614 = vrot.lane.b32.xlu1 %v1571_v10, %s1344_s25  ;;  %s1367_s25 = smov 121  }
  0x99   : > { %833 = vperm.xlu0 %1194, %v509_v13  }
  0x9c   : > { %641 = vrot.lane.b32.xlu1 %v1575_v11, %s1346_s9 }
  0x9d   : > { %1195 = vset.pattern.permute.xlu0 %v1364_v20  ;;  %v370_v20 = vsel %vm1698_vm9, %v1550_v5, 0.0 }
  0x9e   : > { %864 = vperm.xlu0 %1195, %v509_v13  }
  0xa0   : > { %643 = vrot.lane.b32.xlu1 %v1571_v10, %s1346_s9  ;;  %s1369_s9 = smov 123  }
  0xa2   : > { %1196 = vset.pattern.permute.xlu0 %v1365_v21  ;;  %v421_v21 = vsel %vm420_vm10, 1, %v1342_v0  ;;  %vm1764_vm10 = vcmp.eq.s32.totalorder %v500_v42, 1  ;;  %v568_v42 = vrot.slane %v560_v6, %v1673_v49 }
  0xa3   : > { %895 = vperm.xlu0 %1196, %v509_v13  }
  0xa4   : > { %670 = vrot.lane.b32.xlu1 %v1575_v11, %s1348_s10 }
  0xa7   : > { %1197 = vset.pattern.permute.xlu0 %v1366_v22  ;;  %v452_v22 = vsel %vm451_vm11, 1, %v1342_v0  ;;  %vm1772_vm11 = vcmp.eq.s32.totalorder %v504_v47, 1 }
  0xa8   : > { %672 = vrot.lane.b32.xlu1 %v1571_v10, %s1348_s10  ;;  %926 = vperm.xlu0 %1197, %v509_v13   ;;  %s1370_s10 = smov 122   ;;  %v456_v57 = vrot.slane %v452_v22, %v1671_v48  ;;  %v460_v58 = vrot.slane %v452_v22, %v1673_v49  ;;  %v564_v22 = vrot.slane %v560_v6, %v1671_v48 }
  0xac   : > { %773 = vperm.xlu1 %1192, %v509_v13   ;;  %902 = vrot.lane.b32.xlu0 %v1575_v11, %s1367_s25 }
  0xb0   : > { %722 = vrot.lane.b32.xlu1 %v1575_v11, %s1349_s24  ;;  %s1946_s24 = scalar_lea.vmem [#allocation7], %s1061_s2  ;;  %s1070_s2 = sshll.u32 %s1328_s18, 9 }
  0xb1   : > { %1193 = vset.pattern.permute.xlu1 %v1351_v8  ;;  %s2189_s12 = scalar_lea.hbm %s2245_s4, %s1070_s2  ;;  %s1371_s18 = smov [#allocation7]  }
  0xb2   : > { %s1256_s6 = sshll.u32 %s1371_s18, 4  ;;  %s1257_s6 = int_to_ptr.vmem [resolvable:$false] %s1256_s6 }
  0xb3   : > { %s1258_s27 = scalar_lea.vmem %s1257_s6, 1024 }
  0xb4   : > { %802 = vperm.xlu1 %1193, %v509_v13   ;;  %v537_v13 = vrot.slane %v529_v53, %v1673_v49 }
  0xb5   : > { %v1624_v23 = vpop.permute.xlu1 %261 }
  0xb8   : > { %753 = vrot.lane.b32.xlu1 %v1571_v10, %s1350_s14  ;;  %s955_s14 = sshll.u32 %s1946_s24, 4  ;;  %s2191_s14 = int_to_ptr.vmem [resolvable:$true] %s955_s14 }
  0xb9   : > { %p1259_p0 = scmp.lt.s32.totalorder %s2191_s14, %s1257_s6 }
  0xbc   : > { %780 = vrot.lane.b32.xlu1 %v1575_v11, %s1356_s30 }
  0xbe   : > { %v1626_v24 = vpop.permute.xlu0 %256 }
  0xc0   : > { %782 = vrot.lane.b32.xlu1 %v1571_v10, %s1356_s30  ;;  %s1252_s30 = scalar_lea.vmem %s2191_s14, 512 }
  0xc1   : > { %p1253_p1 = scmp.ne.s32.totalorder %s2191_s14, %s1252_s30  ;;  %p1260_p2 = scmp.lt.s32.totalorder %s1258_s27, %s1252_s30 }
  0xc2   : > { %v1630_v25 = vpop.permute.xlu1 %287  ;;  %v1632_v26 = vpop.permute.xlu0 %259 }
  0xc3   : > { %v266_v43 = vsel %vm2249_vm5, %v1632_v26, %v1624_v23  ;;  %v267_v45 = vsel %vm2249_vm5, %v1624_v23, %v1632_v26  ;;  %v425_v23 = vrot.slane %v421_v21, %v1671_v48  ;;  %v429_v26 = vrot.slane %v421_v21, %v1673_v49  ;;  %p1254_p8 = pnand %p1253_p1, %p1489_p13  ;;  %p1261_p3 = por %p1260_p2, %p1259_p0 }
  0xc4   : > { %809 = vrot.lane.b32.xlu1 %v1575_v11, %s1368_s8  ;;  %v282_v61 = vsel %vm1703_vm12, %v267_v45, 0.0  ;;  %v283_v62 = vsel %vm1707_vm13, %v266_v43, 0.0  ;;  %vm1815_vm13 = vcmp.eq.s32.totalorder %v456_v57, 1 }
  0xc5   : > { %v290_v16 = vmul.f32 %v1630_v25, %v282_v61  ;;  %v291_v17 = vmul.f32 %v1630_v25, %v283_v62  ;;  %vm1803_vm5 = vcmp.eq.s32.totalorder %v425_v23, 1  ;;  %vm1807_vm15 = vcmp.eq.s32.totalorder %v429_v26, 1  ;;  %p1255_p12 = pneg %p1254_p8 }
  0xc6   : > { %v1635_v27 = vpop.permute.xlu1 %296  ;;  %v1637_v28 = vpop.permute.xlu0 %294  ;;  %v2293_v61 = vmov 0 }
  0xc7   : > { %v299_v43 = vsel %vm2250_vm8, %v1637_v28, %v1635_v27  ;;  %v300_v25 = vsel %vm2250_vm8, %v1635_v27, %v1637_v28  ;;  %v2294_v61 = vsel %vm1815_vm13, 4294967295, %v2293_v61  ;;  %vm1819_vm8 = vcmp.eq.s32.totalorder %v460_v58, 1  ;;  %p1262_p5 = pnand %p1261_p3, %p1255_p12 }
  0xc8   : > { %811 = vrot.lane.b32.xlu1 %v1571_v10, %s1368_s8  ;;  %vm1836_vm13 = vcmp.eq.s32.totalorder %v537_v13, 1  ;;  %v315_v4 = vsel %vm1726_vm0, %v300_v25, 0.0  ;;  %v316_v6 = vsel %vm1730_vm1, %v299_v43, 0.0  ;;  %v292_v12 = vadd.f32 %v290_v16, %v1626_v24 }
  0xc9   : > { %v293_v38 = vadd.f32 %v291_v17, %v1626_v24  ;;  %vm2307_vm0 = vcmp.lt.s32.totalorder %v1675_v50, 6  ;;  %vm2315_vm6 = vnez %v2294_v61 }
  0xca   : > { %v1640_v29 = vpop.permute.xlu1 %325  ;;  %v1642_v30 = vpop.permute.xlu0 %382  ;;  %vm2308_vm1 = vmmov %vm2307_vm0 }
  0xcc   : > { %840 = vrot.lane.b32.xlu1 %v1575_v11, %s1369_s9 }
  0xce   : > { %v1645_v31 = vpop.permute.xlu1 %327  ;;  %v1647_v32 = vpop.permute.xlu0 %411 }
  0xd0   : > { %842 = vrot.lane.b32.xlu1 %v1571_v10, %s1369_s9 }
  0xd2   : > { %v1650_v33 = vpop.permute.xlu1 %373  ;;  %v1652_v34 = vpop.permute.xlu0 %435 }
  0xd4   : > { %871 = vrot.lane.b32.xlu1 %v1575_v11, %s1370_s10 }
  0xd6   : > { %v1655_v35 = vpop.permute.xlu1 %380 }
  0xd7   : > { %v1657_v36 = vpop.permute.xlu0 %466 }
  0xd8   : > { %873 = vrot.lane.b32.xlu1 %v1571_v10, %s1370_s10 }
  0xda   : > { %v1660_v39 = vpop.permute.xlu1 %404 }
  0xdb   : > { %v1662_v41 = vpop.permute.xlu0 %489 }
  0xdc   : > { %904 = vrot.lane.b32.xlu1 %v1571_v10, %s1367_s25 }
  0xde   : > { %v1666_v44 = vpop.permute.xlu1 %413 }
  0xdf   : > { %v1669_v46 = vpop.permute.xlu0 %519 }
  0xe2   : > { %v1679_v54 = vpop.permute.xlu1 %442 }
  0xe3   : > { %v1683_v59 = vpop.permute.xlu0 %543 }
  0xe6   : > { %v1693_v2 = vpop.permute.xlu1 %444 }
  0xe8   : > { %v1711_v14 = vpop.permute.xlu0 %574 }
  0xea   : > { %v485_v37 = vpop.permute.xlu1 %484 }
  0xed   : > { %v319_v60 = vpop.permute.xlu0 %318 }
  0xee   : > { %v488_v63 = vpop.permute.xlu1 %487  ;;  %v321_v13 = vmul.f32 %v319_v60, %v315_v4  ;;  %v322_v25 = vmul.f32 %v319_v60, %v316_v6 }
  0xef   : > { %v492_v7 = vsel %vm491_vm3, %v488_v63, %v1662_v41  ;;  %v493_v9 = vsel %vm491_vm3, %v1662_v41, %v488_v63  ;;  %vm1787_vm3 = vcmp.eq.s32.totalorder %v398_v52, 1  ;;  %v1841_v63 = vld [vmem:[#allocation5 + $0x3] ss:$8 sm:$0x3] }
  0xf0   : > { %v507_v52 = vsel %vm1764_vm10, %v493_v9, 0.0  ;;  %v508_v53 = vsel %vm1772_vm11, %v492_v7, 0.0  ;;  %vm2299_vm10 = vcmp.lt.s32.totalorder %v1675_v50, 1  ;;  %vm590_vm12 = vcmp.ne.f32.partialorder %v1841_v63, 0.0 }
  0xf1   : > { %v1791_v21 = vpop.permute.xlu0 %581  ;;  %v330_v57 = vsel %vm2299_vm10, %v1640_v29, %v1645_v31  ;;  %vm2300_vm11 = vmmov %vm2299_vm10  ;;  %vm1849_vm10 = vcmp.eq.s32.totalorder %v564_v22, 1 }
  0xf2   : > { %v513_v51 = vpop.permute.xlu1 %512  ;;  %v331_v58 = vsel %vm2300_vm11, %v1645_v31, %v1640_v29  ;;  %vm1853_vm11 = vcmp.eq.s32.totalorder %v568_v42, 1  ;;  %v2305_v31 = vmov 0  ;;  %v347_v43 = vsel %vm1752_vm7, %v330_v57, 0.0 }
  0xf3   : > { %v515_v28 = vmul.f32 %v513_v51, %v507_v52  ;;  %v516_v23 = vmul.f32 %v513_v51, %v508_v53  ;;  %v2306_v31 = vsel %vm1853_vm11, 4294967295, %v2305_v31  ;;  %v346_v42 = vsel %vm1748_vm4, %v331_v58, 0.0 }
  0xf4   : > { %vm2309_vm11 = vcmp.lt.s32.totalorder %v1675_v50, 127  ;;  %vm2311_vm4 = vcmp.lt.s32.totalorder %v1675_v50, 126  ;;  %v323_v52 = vadd.f32 %v321_v13, %v292_v12  ;;  %v324_v53 = vadd.f32 %v322_v25, %v293_v38 }
  0xf5   : > { %v517_v7 = vadd.f32 %v515_v28, %v485_v37  ;;  %v518_v9 = vadd.f32 %v516_v23, %v485_v37  ;;  %v1847_v15 = vpop.permute.xlu0 %663  ;;  %v385_v24 = vsel %vm2309_vm11, %v1655_v35, %v1642_v30  ;;  %v416_v56 = vsel %vm2311_vm4, %v1647_v32, %v1666_v44  ;;  %vm2312_vm7 = vmmov %vm2311_vm4 }
  0xf6   : > { %v522_v40 = vpop.permute.xlu1 %521  ;;  %v417_v16 = vsel %vm2312_vm7, %v1666_v44, %v1647_v32  ;;  %v432_v62 = vsel %vm1803_vm5, %v416_v56, 0.0  ;;  %vm2316_vm5 = vcmp.lt.s32.totalorder %v1675_v50, 5 }
  0xf7   : > { %v524_v37 = vsel %vm2307_vm0, %v1669_v46, %v522_v40  ;;  %v525_v22 = vsel %vm2308_vm1, %v522_v40, %v1669_v46  ;;  %vm2310_vm0 = vmmov %vm2309_vm11  ;;  %v433_v5 = vsel %vm1807_vm15, %v417_v16, 0.0  ;;  %v438_v6 = vmul.f32 %v1652_v34, %v432_v62 }
  0xf8   : > { %v386_v60 = vsel %vm2310_vm0, %v1642_v30, %v1655_v35  ;;  %v540_v46 = vsel %vm1824_vm14, %v525_v22, 0.0  ;;  %v541_v55 = vsel %vm1836_vm13, %v524_v37, 0.0  ;;  %vm2313_vm14 = vcmp.lt.s32.totalorder %v1675_v50, 125  ;;  %vm2317_vm9 = vmmov %vm2316_vm5 }
  0xf9   : > { %v546_v17 = vmul.f32 %v1683_v59, %v540_v46  ;;  %v547_v30 = vmul.f32 %v1683_v59, %v541_v55  ;;  %v447_v35 = vsel %vm2313_vm14, %v1679_v54, %v1693_v2  ;;  %vm2314_vm13 = vmmov %vm2313_vm14  ;;  %v376_v59 = vmul.f32 %v1650_v33, %v370_v20 }
  0xfa   : > { %v448_v51 = vsel %vm2314_vm13, %v1693_v2, %v1679_v54  ;;  %v551_v28 = vpop.permute.xlu1 %550  ;;  %v350_v23 = vpop.permute.xlu0 %349  ;;  %v377_v54 = vmul.f32 %v1650_v33, %v371_v18  ;;  %v401_v2 = vsel %vm1783_vm2, %v385_v24, 0.0  ;;  %v402_v58 = vsel %vm1787_vm3, %v386_v60, 0.0  ;;  %v618_v60 = vld [vmem:[#allocation5 + $0x4] ss:$8 sm:$0x3] }
  0xfb   : > { %v548_v26 = vadd.f32 %v546_v17, %v517_v7  ;;  %v549_v32 = vadd.f32 %v547_v30, %v518_v9  ;;  %v352_v44 = vmul.f32 %v350_v23, %v346_v42  ;;  %v353_v57 = vmul.f32 %v350_v23, %v347_v43 }
  0xfc   : > { %v407_v1 = vmul.f32 %v1660_v39, %v401_v2  ;;  %v408_v3 = vmul.f32 %v1660_v39, %v402_v58  ;;  %v463_v33 = vsel %vm2315_vm6, %v447_v35, 0.0  ;;  %v464_v18 = vsel %vm1819_vm8, %v448_v51, 0.0 }
  0xfd   : > { %v354_v8 = vadd.f32 %v352_v44, %v323_v52  ;;  %v355_v20 = vadd.f32 %v353_v57, %v324_v53  ;;  %v439_v7 = vmul.f32 %v1652_v34, %v433_v5  ;;  %vm2318_vm15 = vnez %v2306_v31  ;;  %v647_v53 = vld [vmem:[#allocation5 + $0x5] ss:$8 sm:$0x3] }
  0xfe   : > { %v553_v41 = vpop.permute.xlu1 %552  ;;  %v469_v13 = vmul.f32 %v1657_v36, %v463_v33  ;;  %v470_v25 = vmul.f32 %v1657_v36, %v464_v18  ;;  %v591_v34 = vsel %vm590_vm12, 1, %v1342_v0  ;;  %vm585_vm8 = vcmp.lt.s32.totalorder %v1675_v50, 4 }
  0xff   : > { %v378_v19 = vadd.f32 %v376_v59, %v354_v8  ;;  %v379_v4 = vadd.f32 %v377_v54, %v355_v20  ;;  %v555_v45 = vsel %vm2316_vm5, %v551_v28, %v553_v41  ;;  %v556_v47 = vsel %vm2317_vm9, %v553_v41, %v551_v28 }
 0x100   : > { %v571_v39 = vsel %vm1849_vm10, %v556_v47, 0.0  ;;  %v572_v61 = vsel %vm2318_vm15, %v555_v45, 0.0  ;;  %v595_v24 = vrot.slane %v591_v34, %v1671_v48  ;;  %vm619_vm12 = vcmp.ne.f32.partialorder %v618_v60, 0.0 }
 0x101   : > { %v409_v27 = vadd.f32 %v407_v1, %v378_v19  ;;  %v410_v9 = vadd.f32 %v408_v3, %v379_v4  ;;  %v577_v12 = vmul.f32 %v1711_v14, %v571_v39  ;;  %v578_v38 = vmul.f32 %v1711_v14, %v572_v61 }
 0x102   : > { %v606_v40 = vpop.permute.xlu1 %605  ;;  %v599_v14 = vrot.slane %v591_v34, %v1673_v49  ;;  %vm600_vm2 = vcmp.eq.s32.totalorder %v595_v24, 1  ;;  %v620_v35 = vsel %vm619_vm12, 1, %v1342_v0  ;;  %vm648_vm10 = vcmp.ne.f32.partialorder %v647_v53, 0.0  ;;  %v676_v34 = vld [vmem:[#allocation5 + $0x6] ss:$8 sm:$0x3] }
 0x103   : > { %v440_v29 = vadd.f32 %v438_v6, %v409_v27  ;;  %v441_v37 = vadd.f32 %v439_v7, %v410_v9  ;;  %v579_v22 = vadd.f32 %v577_v12, %v548_v26  ;;  %v580_v31 = vadd.f32 %v578_v38, %v549_v32  ;;  %v693_v12 = vpop.permute.xlu0 %692  ;;  %v757_v24 = vld [vmem:[#allocation5 + $0x11] ss:$8 sm:$0x3] }
 0x104   : > { %vm601_vm3 = vcmp.eq.s32.totalorder %v599_v14, 1  ;;  %v624_v32 = vrot.slane %v620_v35, %v1671_v48  ;;  %v628_v59 = vrot.slane %v620_v35, %v1673_v49  ;;  %v649_v2 = vsel %vm648_vm10, 1, %v1342_v0  ;;  %v786_v14 = vld [vmem:[#allocation5 + $0x12] ss:$8 sm:$0x3] }
 0x105   : > { %v471_v42 = vadd.f32 %v469_v13, %v440_v29  ;;  %v472_v43 = vadd.f32 %v470_v25, %v441_v37  ;;  %vm2319_vm0 = vcmp.lt.s32.totalorder %v1675_v50, 3  ;;  %v653_v62 = vrot.slane %v649_v2, %v1671_v48 }
 0x106   : > { %vm629_vm11 = vcmp.eq.s32.totalorder %v624_v32, 1  ;;  %vm630_vm1 = vcmp.eq.s32.totalorder %v628_v59, 1  ;;  %vm2320_vm4 = vmmov %vm2319_vm0  ;;  %v657_v5 = vrot.slane %v649_v2, %v1673_v49  ;;  %vm2321_vm13 = vcmp.lt.s32.totalorder %v1675_v50, 2  ;;  %v848_v32 = vld [vmem:[#allocation5 + $0x14] ss:$8 sm:$0x3] }
 0x107   : > { %v473_v46 = vmax.f32 %v471_v42, 0.0  ;;  %v474_v55 = vmax.f32 %v472_v43, 0.0  ;;  %v635_v36 = vpop.permute.xlu1 %634  ;;  %vm658_vm7 = vcmp.eq.s32.totalorder %v653_v62, 1  ;;  %vm2322_vm6 = vmmov %vm2321_vm13  ;;  %v1974_v25 = vpop.permute.xlu0 %715  ;;  %vm677_vm5 = vcmp.ne.f32.partialorder %v676_v34, 0.0 }
 0x108   : > { %vm659_vm14 = vcmp.eq.s32.totalorder %v657_v5, 1  ;;  %v728_v42 = vld [vmem:[#allocation5 + $0x10] ss:$8 sm:$0x3]  ;;  %vm787_vm12 = vcmp.ne.f32.partialorder %v786_v14, 0.0  ;;  %vm2327_vm10 = vcmp.lt.s32.totalorder %v1675_v50, 1 }
 0x109   : > { %v475_v56 = vmin.f32 %v473_v46, 6.0  ;;  %v476_v16 = vmin.f32 %v474_v55, 6.0  ;;  %vm729_vm15 = vcmp.ne.f32.partialorder %v728_v42, 0.0  ;;  %v788_v35 = vsel %vm787_vm12, 1, %v1342_v0 }
 0x10a   : > { %v792_v62 = vrot.slane %v788_v35, %v1671_v48 }
 0x10b   : > { %477 = vst [vmem:[%s1946_s24] sm:$0xff] %v475_v56  ;;  %478 = vst [vmem:[%s1946_s24 + $0x8] sm:$0xff] %v476_v16  ;;  %v584_v63 = vpop.permute.xlu1 %583  ;;  %v1978_v29 = vpop.permute.xlu0 %744 }
 0x10c   : > { %v586_v17 = vsel %vm585_vm8, %v1791_v21, %v584_v63  ;;  %v587_v30 = vsel %vm585_vm8, %v584_v63, %v1791_v21  ;;  %vm758_vm8 = vcmp.ne.f32.partialorder %v757_v24, 0.0 }
 0x10d   : > { %v602_v51 = vsel %vm600_vm2, %v587_v30, 0.0  ;;  %v603_v52 = vsel %vm601_vm3, %v586_v17, 0.0  ;;  %v730_v17 = vsel %vm729_vm15, 1, %v1342_v0  ;;  %v759_v30 = vsel %vm758_vm8, 1, %v1342_v0 }
 0x10e   : > { %v608_v28 = vmul.f32 %v606_v40, %v602_v51  ;;  %v609_v23 = vmul.f32 %v606_v40, %v603_v52  ;;  %v817_v52 = vld [vmem:[#allocation5 + $0x13] ss:$8 sm:$0x3]  ;;  %v734_v59 = vrot.slane %v730_v17, %v1671_v48  ;;  %vm2345_vm8 = vcmp.lt.s32.totalorder %v1675_v50, 127 }
 0x10f   : > { %v613_v26 = vpop.permute.xlu1 %612  ;;  %v725_v43 = vpop.permute.xlu0 %724  ;;  %vm2346_vm12 = vmmov %vm2345_vm8 }
 0x110   : > { %v610_v44 = vadd.f32 %v608_v28, %v579_v22  ;;  %v611_v57 = vadd.f32 %v609_v23, %v580_v31  ;;  %v699_v22 = vld [vmem:[#allocation5 + $0x7] ss:$8 sm:$0x3]  ;;  %v678_v31 = vsel %vm677_vm5, 1, %v1342_v0 }
 0x111   : > { %vm700_vm9 = vcmp.ne.f32.partialorder %v699_v22, 0.0  ;;  %v682_v55 = vrot.slane %v678_v31, %v1671_v48 }
 0x112   : > { %v701_v60 = vsel %vm700_vm9, 1, %v1342_v0  ;;  %vm2051_vm9 = vcmp.eq.s32.totalorder %v792_v62, 1 }
 0x113   : > { %v615_v54 = vpop.permute.xlu1 %614  ;;  %v705_v56 = vrot.slane %v701_v60, %v1671_v48  ;;  %v709_v16 = vrot.slane %v701_v60, %v1673_v49  ;;  %v752_v63 = vpop.permute.xlu0 %751  ;;  %vm1995_vm2 = vcmp.eq.s32.totalorder %v682_v55, 1 }
 0x114   : > { %v616_v21 = vsel %vm2319_vm0, %v613_v26, %v615_v54  ;;  %v617_v58 = vsel %vm2320_vm4, %v615_v54, %v613_v26  ;;  %v738_v54 = vrot.slane %v730_v17, %v1673_v49  ;;  %vm818_vm4 = vcmp.ne.f32.partialorder %v817_v52, 0.0 }
 0x115   : > { %v631_v8 = vsel %vm629_vm11, %v617_v58, 0.0  ;;  %v632_v20 = vsel %vm630_vm1, %v616_v21, 0.0  ;;  %vm2328_vm11 = vmmov %vm2327_vm10  ;;  %vm2007_vm1 = vcmp.eq.s32.totalorder %v705_v56, 1  ;;  %vm2011_vm0 = vcmp.eq.s32.totalorder %v709_v16, 1 }
 0x116   : > { %v637_v3 = vmul.f32 %v635_v36, %v631_v8  ;;  %v638_v33 = vmul.f32 %v635_v36, %v632_v20  ;;  %v686_v36 = vrot.slane %v678_v31, %v1673_v49  ;;  %v763_v21 = vrot.slane %v759_v30, %v1671_v48 }
 0x117   : > { %v642_v1 = vpop.permute.xlu1 %641  ;;  %v2017_v2 = vpop.permute.xlu0 %833  ;;  %v767_v58 = vrot.slane %v759_v30, %v1673_v49  ;;  %v796_v20 = vrot.slane %v788_v35, %v1673_v49 }
 0x118   : > { %v639_v47 = vadd.f32 %v637_v3, %v610_v44  ;;  %v640_v6 = vadd.f32 %v638_v33, %v611_v57  ;;  %vm1999_vm3 = vcmp.eq.s32.totalorder %v686_v36, 1  ;;  %v712_v3 = vsel %vm2007_vm1, %v1575_v11, 0.0 }
 0x119   : > { %v713_v33 = vsel %vm2011_vm0, %v1571_v10, 0.0  ;;  %vm2047_vm5 = vcmp.eq.s32.totalorder %v767_v58, 1  ;;  %vm2055_vm15 = vcmp.eq.s32.totalorder %v796_v20, 1  ;;  %v718_v55 = vmul.f32 %v1974_v25, %v712_v3 }
 0x11a   : > { %v719_v36 = vmul.f32 %v1974_v25, %v713_v33 }
 0x11b   : > { %v644_v18 = vpop.permute.xlu1 %643 }
 0x11c   : > { %v645_v41 = vsel %vm2321_vm13, %v642_v1, %v644_v18  ;;  %v646_v19 = vsel %vm2322_vm6, %v644_v18, %v642_v1  ;;  %vm2038_vm13 = vcmp.eq.s32.totalorder %v738_v54, 1  ;;  %vm2043_vm6 = vcmp.eq.s32.totalorder %v763_v21, 1 }
 0x11d   : > { %v660_v4 = vsel %vm658_vm7, %v646_v19, 0.0  ;;  %v661_v45 = vsel %vm659_vm14, %v645_v41, 0.0  ;;  %vm849_vm7 = vcmp.ne.f32.partialorder %v848_v32, 0.0  ;;  %vm2033_vm14 = vcmp.eq.s32.totalorder %v734_v59, 1 }
 0x11e   : > { %v666_v7 = vmul.f32 %v1847_v15, %v660_v4  ;;  %v667_v39 = vmul.f32 %v1847_v15, %v661_v45  ;;  %v819_v41 = vsel %vm818_vm4, 1, %v1342_v0  ;;  %vm844_vm4 = vcmp.lt.s32.totalorder %v1675_v50, 123 }
 0x11f   : > { %v671_v61 = vpop.permute.xlu1 %670  ;;  %v823_v22 = vrot.slane %v819_v41, %v1671_v48  ;;  %v827_v31 = vrot.slane %v819_v41, %v1673_v49 }
 0x120   : > { %v1968_v27 = vadd.f32 %v666_v7, %v639_v47  ;;  %v1970_v9 = vadd.f32 %v667_v39, %v640_v6  ;;  %v850_v47 = vsel %vm849_vm7, 1, %v1342_v0  ;;  %v879_v6 = vld [vmem:[#allocation5 + $0x15] ss:$8 sm:$0x3]  ;;  %vm2353_vm7 = vcmp.lt.s32.totalorder %v1675_v50, 125 }
 0x121   : > { %v854_v42 = vrot.slane %v850_v47, %v1671_v48  ;;  %v858_v24 = vrot.slane %v850_v47, %v1673_v49  ;;  %vm2086_vm1 = vcmp.eq.s32.totalorder %v823_v22, 1  ;;  %vm2090_vm0 = vcmp.eq.s32.totalorder %v827_v31, 1 }
 0x123   : > { %v673_v38 = vpop.permute.xlu1 %672 }
 0x124   : > { %v674_v23 = vsel %vm2327_vm10, %v671_v61, %v673_v38  ;;  %v675_v26 = vsel %vm2328_vm11, %v673_v38, %v671_v61  ;;  %vm2347_vm10 = vcmp.lt.s32.totalorder %v1675_v50, 126 }
 0x125   : > { %v689_v5 = vsel %vm1995_vm2, %v675_v26, 0.0  ;;  %v690_v8 = vsel %vm1999_vm3, %v674_v23, 0.0  ;;  %vm813_vm2 = vcmp.lt.s32.totalorder %v1675_v50, 124  ;;  %vm880_vm3 = vcmp.ne.f32.partialorder %v879_v6, 0.0  ;;  %vm2348_vm11 = vmmov %vm2347_vm10 }
 0x126   : > { %v695_v19 = vmul.f32 %v693_v12, %v689_v5  ;;  %v696_v4 = vmul.f32 %v693_v12, %v690_v8  ;;  %v2059_v12 = vpop.permute.xlu0 %864  ;;  %v881_v30 = vsel %vm880_vm3, 1, %v1342_v0 }
 0x127   : > { %v1972_v13 = vpop.permute.xlu1 %773  ;;  %v885_v57 = vrot.slane %v881_v30, %v1671_v48  ;;  %v889_v5 = vrot.slane %v881_v30, %v1673_v49 }
 0x128   : > { %v697_v14 = vadd.f32 %v695_v19, %v1968_v27  ;;  %v698_v60 = vadd.f32 %v696_v4, %v1970_v9 }
 0x12a   : > { %v896_v52 = vpop.permute.xlu0 %895  ;;  %v720_v32 = vadd.f32 %v718_v55, %v697_v14  ;;  %v721_v44 = vadd.f32 %v719_v36, %v698_v60 }
 0x12b   : > { %v1976_v40 = vpop.permute.xlu1 %722 }
 0x12c   : > { %v726_v38 = vsel %vm2345_vm8, %v1976_v40, %v725_v43  ;;  %v727_v34 = vsel %vm2346_vm12, %v725_v43, %v1976_v40  ;;  %v910_v40 = vld [vmem:[#allocation5 + $0x16] ss:$8 sm:$0x3]  ;;  %vm2112_vm12 = vcmp.eq.s32.totalorder %v858_v24, 1 }
 0x12d   : > { %v741_v43 = vsel %vm2033_vm14, %v726_v38, 0.0  ;;  %v742_v56 = vsel %vm2038_vm13, %v727_v34, 0.0  ;;  %vm2354_vm14 = vmmov %vm2353_vm7  ;;  %vm2102_vm13 = vcmp.eq.s32.totalorder %v854_v42, 1  ;;  %vm911_vm8 = vcmp.ne.f32.partialorder %v910_v40, 0.0 }
 0x12e   : > { %v747_v53 = vmul.f32 %v1978_v29, %v741_v43  ;;  %v748_v28 = vmul.f32 %v1978_v29, %v742_v56  ;;  %v912_v8 = vsel %vm911_vm8, 1, %v1342_v0  ;;  %v927_v0 = vpop.permute.xlu0 %926 }
 0x12f   : > { %v1980_v37 = vpop.permute.xlu1 %802  ;;  %v916_v45 = vrot.slane %v912_v8, %v1671_v48  ;;  %v920_v47 = vrot.slane %v912_v8, %v1673_v49 }
 0x130   : > { %v749_v20 = vadd.f32 %v747_v53, %v720_v32  ;;  %v750_v3 = vadd.f32 %v748_v28, %v721_v44 }
 0x131   : > { %vm2172_vm3 = vcmp.eq.s32.totalorder %v920_v47, 1 }
 0x133   : > { %v1982_v15 = vpop.permute.xlu1 %753 }
 0x134   : > { %v755_v16 = vsel %vm2347_vm10, %v752_v63, %v1982_v15  ;;  %v756_v27 = vsel %vm2348_vm11, %v1982_v15, %v752_v63 }
 0x135   : > { %v770_v23 = vsel %vm2043_vm6, %v755_v16, 0.0  ;;  %v771_v26 = vsel %vm2047_vm5, %v756_v27, 0.0  ;;  %vm875_vm6 = vcmp.lt.s32.totalorder %v1675_v50, 122  ;;  %vm2149_vm5 = vcmp.eq.s32.totalorder %v885_v57, 1 }
 0x136   : > { %v776_v58 = vmul.f32 %v1972_v13, %v770_v23  ;;  %v777_v62 = vmul.f32 %v1972_v13, %v771_v26 }
 0x137   : > { %v1986_v46 = vpop.permute.xlu1 %780 }
 0x138   : > { %v778_v6 = vadd.f32 %v776_v58, %v749_v20  ;;  %v779_v11 = vadd.f32 %v777_v62, %v750_v3 }
 0x13b   : > { %v783_v51 = vpop.permute.xlu1 %782 }
 0x13c   : > { %v784_v35 = vsel %vm2353_vm7, %v1986_v46, %v783_v51  ;;  %v785_v15 = vsel %vm2354_vm14, %v783_v51, %v1986_v46 }
 0x13d   : > { %v799_v59 = vsel %vm2051_vm9, %v784_v35, 0.0  ;;  %v800_v29 = vsel %vm2055_vm15, %v785_v15, 0.0  ;;  %vm2153_vm9 = vcmp.eq.s32.totalorder %v889_v5, 1  ;;  %vm906_vm15 = vcmp.lt.s32.totalorder %v1675_v50, 121 }
 0x13e   : > { %v805_v41 = vmul.f32 %v1980_v37, %v799_v59 }
 0x13f   : > { %v810_v1 = vpop.permute.xlu1 %809 }
 0x140   : > { %v807_v49 = vadd.f32 %v805_v41, %v778_v6 }
 0x143   : > { %v812_v61 = vpop.permute.xlu1 %811 }
 0x144   : > { %v814_v54 = vsel %vm813_vm2, %v810_v1, %v812_v61  ;;  %v815_v21 = vsel %vm813_vm2, %v812_v61, %v810_v1  ;;  %v806_v1 = vmul.f32 %v1980_v37, %v800_v29  ;;  %vm2168_vm2 = vcmp.eq.s32.totalorder %v916_v45, 1 }
 0x145   : > { %v830_v13 = vsel %vm2086_vm1, %v814_v54, 0.0  ;;  %v831_v19 = vsel %vm2090_vm0, %v815_v21, 0.0 }
 0x146   : > { %v836_v7 = vmul.f32 %v2017_v2, %v830_v13  ;;  %v837_v39 = vmul.f32 %v2017_v2, %v831_v19  ;;  %v808_v38 = vadd.f32 %v806_v1, %v779_v11 }
 0x147   : > { %v841_v9 = vpop.permute.xlu1 %840 }
 0x148   : > { %v838_v36 = vadd.f32 %v836_v7, %v807_v49  ;;  %v839_v40 = vadd.f32 %v837_v39, %v808_v38 }
 0x14b   : > { %v843_v51 = vpop.permute.xlu1 %842 }
 0x14c   : > { %v845_v33 = vsel %vm844_vm4, %v841_v9, %v843_v51  ;;  %v846_v18 = vsel %vm844_vm4, %v843_v51, %v841_v9 }
 0x14d   : > { %v861_v10 = vsel %vm2102_vm13, %v845_v33, 0.0  ;;  %v862_v37 = vsel %vm2112_vm12, %v846_v18, 0.0 }
 0x14e   : > { %v867_v22 = vmul.f32 %v2059_v12, %v861_v10  ;;  %v868_v31 = vmul.f32 %v2059_v12, %v862_v37  ;;  %v903_v12 = vpop.permute.xlu0 %902 }
 0x14f   : > { %v872_v4 = vpop.permute.xlu1 %871 }
 0x150   : > { %v869_v27 = vadd.f32 %v867_v22, %v838_v36  ;;  %v870_v9 = vadd.f32 %v868_v31, %v839_v40 }
 0x153   : > { %v874_v34 = vpop.permute.xlu1 %873 }
 0x154   : > { %v876_v2 = vsel %vm875_vm6, %v872_v4, %v874_v34  ;;  %v877_v42 = vsel %vm875_vm6, %v874_v34, %v872_v4 }
 0x155   : > { %v892_v24 = vsel %vm2149_vm5, %v876_v2, 0.0  ;;  %v893_v14 = vsel %vm2153_vm9, %v877_v42, 0.0 }
 0x156   : > { %v898_v43 = vmul.f32 %v896_v52, %v892_v24  ;;  %v899_v56 = vmul.f32 %v896_v52, %v893_v14 }
 0x157   : > { %v905_v16 = vpop.permute.xlu1 %904 }
 0x158   : > { %v907_v17 = vsel %vm906_vm15, %v903_v12, %v905_v16  ;;  %v908_v25 = vsel %vm906_vm15, %v905_v16, %v903_v12  ;;  %v900_v15 = vadd.f32 %v898_v43, %v869_v27  ;;  %v901_v63 = vadd.f32 %v899_v56, %v870_v9 }
 0x159   : > { %v923_v30 = vsel %vm2168_vm2, %v907_v17, 0.0  ;;  %v924_v35 = vsel %vm2172_vm3, %v908_v25, 0.0 }
 0x15a   : > { %v929_v52 = vmul.f32 %v927_v0, %v923_v30  ;;  %v930_v53 = vmul.f32 %v927_v0, %v924_v35 }
 0x15c   : > { %v931_v28 = vadd.f32 %v929_v52, %v900_v15  ;;  %v932_v23 = vadd.f32 %v930_v53, %v901_v63 }
 0x15e   : > { %v933_v50 = vmax.f32 %v931_v28, 0.0  ;;  %v934_v26 = vmax.f32 %v932_v23, 0.0 }
 0x160   : > { %v935_v32 = vmin.f32 %v933_v50, 6.0  ;;  %v936_v44 = vmin.f32 %v934_v26, 6.0 }
 0x162   : > { %937 = vst [vmem:[%s1946_s24 + $0x10] sm:$0xff] %v935_v32  ;;  %938 = vst [vmem:[%s1946_s24 + $0x18] sm:$0xff] %v936_v44 }
 0x163   : > { %1265 = shalt.err (!%p1262_p5)
}
 0x164   : > { %s1266_s7 = scalar_lea.hbm %s2189_s12, 512  ;;  %s1270_s8 = scalar_lea.hbm %s2245_s4, 1024 }
 0x165   : > { %p1267_p7 = scmp.ne.s32.totalorder %s2189_s12, %s1266_s7  ;;  %p1271_p9 = scmp.lt.s32.totalorder %s2189_s12, %s2245_s4 }
 0x166   : > { %p1272_p11 = scmp.lt.s32.totalorder %s1270_s8, %s1266_s7 }
 0x167   : > { %p1268_p4 = pnand %p1267_p7, %p1489_p13 }
 0x168   : > { %p1273_p10 = por %p1272_p11, %p1271_p9 }
 0x169   : > { %p1269_p6 = pneg %p1268_p4 }
 0x16b   : > { %p1274_p1 = pnand %p1273_p10, %p1269_p6 }
 0x16d   : > { %1277 = shalt.err (!%p1274_p1)
}
 0x16e   : > { %s1372_s24 = smov 256   ;;  %s1373_s2 = smov 16  }
 0x16f   : > { %1077 = dma.vmem_to_hbm [thread:$0]  (%p1489_p13), %s2191_s14, 512, %s2189_s12, %s940_s22, %s1372_s24, %s1372_s24, %s1373_s2  }
 0x170 PF: > { %s970_s11 = sand.u32 1, %s1316_s15   ;;  %p2367_p8 = scmp.ne.s32.totalorder %s2255_s26, 0 }
 0x171   : > { %p2368_p12 = scmp.ge.s32.totalorder %s1336_s20, 2  ;;  %s971_s29 = scalar_lea.sflag [#allocation4], %s970_s11 }
 0x173   : > { %p1088_p0 = pnand %p2368_p12, %p2367_p8 }
 0x175   : > { %p1089_p2 = pneg %p1088_p0 }
 0x177   : > { %1311 = dma.done.wait (%p1089_p2), %s971_s29, 512  }
 0x178   : > { %1313 = vsyncadd (%p1089_p2), %s971_s29, 4294966784  ;;  %s21_s20 = sadd.s32 1, %s1336_s20   ;;  %s2369_s15 = smov %s1320_s16 }
 0x179   : > { %p18_p3 = scmp.ge.s32.totalorder %s21_s20, 4   ;;  %s2370_s16 = smov %s1324_s17 }
 0x17a   : > { %s2371_s17 = smov %s1498_s28  ;;  %s2372_s18 = smov %s1332_s19 }
 0x17b   : > { %s2373_s19 = smov %s2375_s5  ;;  %20 = sbr.rel (!%p18_p3) target bundleno = 9 (0x9), region = 99 }
 0x180   :  { %976 = vsyncpa [#allocation3], 1 }
 0x181   :  { %978 = vsyncpa [#allocation3 + $0x1], 1 }
 0x182   :  { %979 = vsyncpa [#allocation6], 1 }
 0x183   :  { %980 = vsyncpa [#allocation4], 1 }
 0x184   :  { %982 = vsyncpa [#allocation4 + $0x1], 1 }

</bundles_post_ra>
